<compile_context>
chip_gen: v5e
topology: v5e:2x2
jax: 0.10.0
libtpu: 0.0.40
codegen_flags: <defaults>
</compile_context>

<pallas_src>
import jax
import jax.numpy as jnp
from jax.experimental import pallas as pl
from jax.experimental.pallas import tpu as pltpu

L_IN = 244      # input length implied by fc1 (244 -> 122 -> 61)
S = 61          # positions after both pools
C1 = 16         # conv1 out channels
C2 = 32         # conv2 out channels
F1 = C2 * S     # 1952 fc1 input features
H1 = 128        # fc1 output features


def _vmem_spec():
    return pl.BlockSpec(memory_space=pltpu.MemorySpace.VMEM)


def _cnn_kernel(p_ref, w1p_ref, b1p_ref, w2p_ref, b2p_ref,
                fw1_hbm, fb1_ref, fw2_ref, fb2_ref,
                o_ref,
                fw1_vmem, dma_sem, h2_ref, flat_ref):
    """Whole forward pass, fused.

    p_ref   : (B*61, 16) f32, rows s-major (r = s*B + b); lanes 0..9 hold the
              input phase streams t_k(b,s) = xpad[4s-2+k], lanes 10..15 = 0.
    w1p_ref : (16, 128) f32 packed conv1 block weight (8 output phases x 16ch)
    b1p_ref : (1, 128)  f32 conv1 bias tiled x8
    w2p_ref : (64, 64)  f32 conv2 block weight  [[w0,0],[w1,w0],[w2,w1],[0,w2]]
    b2p_ref : (1, 64)   f32 conv2 bias tiled x2
    fw1_hbm : (1952, 128) bf16 fc1 weight (rows pre-permuted to s*32+c), ANY
    fb1_ref : (1, 128) f32     fw2_ref : (1, 128) f32     fb2_ref : (1, 1) f32
    o_ref   : (B, 1) f32 output
    fw1_vmem: (1952, 128) bf16 VMEM scratch (manual DMA target)
    h2_ref  : (B*61, 32) f32 VMEM scratch (pooled conv2 output)
    flat_ref: (B, 1952) f32 VMEM scratch (fc1 input, torch-flatten order)
    """
    B = o_ref.shape[0]
    R = p_ref.shape[0]            # B * 61

    # Kick off the fc1 weight DMA immediately; it overlaps the conv compute.
    fw1_cp = pltpu.make_async_copy(fw1_hbm, fw1_vmem, dma_sem)
    fw1_cp.start()

    # conv1 (+bias): one MXU push computing the 8 conv1 outputs each output
    # position needs (y[4s-2..4s+5]), 16 channels each -> 128 lanes.
    z1 = jnp.dot(p_ref[...], w1p_ref[...],
                 preferred_element_type=jnp.float32) + b1p_ref[...]   # (R,128)

    # ReLU + MaxPool1d(2,2): max of the two 64-lane phase halves.
    # Result lanes: [he0 | ho0 | he1 | ho1] = [h1[2s-1] | h1[2s] | h1[2s+1] | h1[2s+2]]
    v = jnp.maximum(jnp.maximum(z1[:, 0:64], z1[:, 64:128]), 0.0)     # (R,64)

    # conv2's zero padding: h1pad[0]=0 (he0 at s==0, rows 0..B-1) and
    # h1pad[123]=0 (ho1 at s==60, rows R-B..R-1).
    rows = jax.lax.broadcasted_iota(jnp.int32, (R, 64), 0)
    cols = jax.lax.broadcasted_iota(jnp.int32, (R, 64), 1)
    pad_mask = ((cols < C1) & (rows < B)) | ((cols >= 3 * C1) & (rows >= R - B))
    x2 = jnp.where(pad_mask, 0.0, v)

    # conv2 (+bias): one (R,64)x(64,64) block matmul -> lanes [ze | zo].
    z2 = jnp.dot(x2, w2p_ref[...],
                 preferred_element_type=jnp.float32) + b2p_ref[...]   # (R,64)

    # ReLU + MaxPool1d(2,2): 64 -> 32 lane max.  Row r = s*B + b.
    h2_ref[...] = jnp.maximum(jnp.maximum(z2[:, 0:C2], z2[:, C2:2 * C2]), 0.0)

    # Flatten to torch's view(-1, 32*61) order (fc1 rows are pre-permuted to
    # s*32+c): 61 static contiguous row-slab -> lane-slab copies.
    for s in range(S):
        flat_ref[:, C2 * s:C2 * (s + 1)] = h2_ref[s * B:(s + 1) * B, :]

    # fc1 (+ReLU): bf16 activations x bf16 weights on the MXU (no f32 upcast
    # of the ~500 KB weight).  Wait for the overlapped DMA only here.
    fw1_cp.wait()
    a1 = jnp.dot(flat_ref[...].astype(jnp.bfloat16), fw1_vmem[...],
                 preferred_element_type=jnp.float32) + fb1_ref[...]   # (B,128)
    a1 = jnp.maximum(a1, 0.0)

    # fc2: single output feature -> lane reduction instead of an N=1 matmul.
    o_ref[...] = jnp.sum(a1 * fw2_ref[...], axis=-1, keepdims=True) + fb2_ref[...]


def cnn_fused(p, w1p, b1p, w2p, b2p, fw1, fb1, fw2, fb2):
    R = p.shape[0]
    B = R // S
    return pl.pallas_call(
        _cnn_kernel,
        out_shape=jax.ShapeDtypeStruct((B, 1), jnp.float32),
        in_specs=[_vmem_spec(), _vmem_spec(), _vmem_spec(), _vmem_spec(),
                  _vmem_spec(),
                  pl.BlockSpec(memory_space=pl.ANY),   # fc1 weight: manual DMA
                  _vmem_spec(), _vmem_spec(), _vmem_spec()],
        out_specs=_vmem_spec(),
        scratch_shapes=[pltpu.VMEM((F1, H1), jnp.bfloat16),
                        pltpu.SemaphoreType.DMA,
                        pltpu.VMEM((R, C2), jnp.float32),
                        pltpu.VMEM((B, F1), jnp.float32)],
        compiler_params=pltpu.CompilerParams(
            vmem_limit_bytes=32 * 1024 * 1024),
    )(p, w1p, b1p, w2p, b2p, fw1, fb1, fw2, fb2)


def init_params(key):
    """Deterministic synthetic parameters with the module's shapes.

    conv weights stored as (k, Cin, Cout); linear weights stored as (in, out)
    (transposed relative to torch's (out, in)).  fc1's weight values are
    rounded to bf16 (it is shipped to the kernel in bf16)."""
    ks = jax.random.split(key, 8)
    s = 0.05
    fw1 = jax.random.normal(ks[4], (F1, H1), jnp.float32) * s
    fw1 = fw1.astype(jnp.bfloat16).astype(jnp.float32)
    return {
        "cw1": jax.random.normal(ks[0], (3, 1, C1), jnp.float32) * s,
        "cb1": jax.random.normal(ks[1], (1, C1), jnp.float32) * s,
        "cw2": jax.random.normal(ks[2], (3, C1, C2), jnp.float32) * s,
        "cb2": jax.random.normal(ks[3], (1, C2), jnp.float32) * s,
        "fw1": fw1,
        "fb1": jax.random.normal(ks[5], (1, H1), jnp.float32) * s,
        "fw2": jax.random.normal(ks[6], (H1, 1), jnp.float32) * s,
        "fb2": jax.random.normal(ks[7], (1, 1), jnp.float32) * s,
    }


def prepare_params(p):
    """One-time host-side re-layout of the parameters for the fused kernel."""
    # conv1 packed block weight: input lanes t0..t9 (t_k = xpad[4s-2+k]),
    # output lane groups g0..g7 = conv1 outputs
    #   [y[4s-2], y[4s], y[4s+2], y[4s+4], y[4s-1], y[4s+1], y[4s+3], y[4s+5]]
    # so that max(lanes 0:64, lanes 64:128) yields [h1[2s-1]|h1[2s]|h1[2s+1]|h1[2s+2]].
    w1v = p["cw1"][:, 0, :]                       # (3, 16), Cin=1 squeezed
    w1p = jnp.zeros((16, 8 * C1), jnp.float32)
    group_base_t = [0, 2, 4, 6, 1, 3, 5, 7]       # first tap's t-index per group
    for g, tb in enumerate(group_base_t):
        for k in range(3):
            w1p = w1p.at[tb + k, g * C1:(g + 1) * C1].set(w1v[k])
    b1p = jnp.tile(p["cb1"], (1, 8))              # (1, 128)

    # conv2 block weight: inputs [he0|ho0|he1|ho1], outputs [ze|zo]:
    #   ze = he0@w0 + ho0@w1 + he1@w2 ; zo = ho0@w0 + he1@w1 + ho1@w2
    w2p = jnp.zeros((4 * C1, 2 * C2), jnp.float32)
    for k in range(3):
        w2p = w2p.at[C1 * k:C1 * (k + 1), 0:C2].set(p["cw2"][k])
        w2p = w2p.at[C1 * (k + 1):C1 * (k + 2), C2:2 * C2].set(p["cw2"][k])
    b2p = jnp.tile(p["cb2"], (1, 2))              # (1, 64)

    # fc1 rows are indexed c*61+s (torch channel-major flatten); permute to
    # s*32+c so the kernel-side flatten is plain [rows s*B:(s+1)*B -> lanes].
    fw1p = p["fw1"].reshape(C2, S, H1).transpose(1, 0, 2).reshape(F1, H1)
    return {
        "cw1p": w1p, "cb1p": b1p,
        "cw2p": w2p, "cb2p": b2p,
        "fw1": fw1p.astype(jnp.bfloat16),         # ~95% of HBM bytes -> bf16
        "fb1": p["fb1"],
        "fw2": p["fw2"].reshape(1, H1),           # row vector for VPU fc2
        "fb2": p["fb2"],
    }


@jax.jit
def cnn_forward(x_ncl, kp):
    """x_ncl: (B, 1, 244) float32 — same NCW layout as the PyTorch module."""
    B = x_ncl.shape[0]
    assert x_ncl.shape[1] == 1 and x_ncl.shape[2] == L_IN, x_ncl.shape
    # TODO(synk): nn.Dropout(p=0.1) is identity in inference mode; omitted.

    # Build the 10 phase streams t_k(b,s) = xpad[4s-2+k] (zero outside range)
    # on ~60 KB of data; rows ordered s-major (row = s*B + b) so the in-kernel
    # flatten and the conv2 boundary masks use only static contiguous slices.
    x2d = x_ncl[:, 0, :]                                   # (B, 244)
    ext = jnp.pad(x2d, ((0, 0), (3, 3)))                   # (B, 250): ext[i] = xpad[i-2]
    phases = jnp.stack([ext[:, k:k + 4 * S:4] for k in range(10)], axis=-1)
    phases = jnp.pad(phases, ((0, 0), (0, 0), (0, 6)))     # (B, 61, 16)
    p_in = phases.transpose(1, 0, 2).reshape(S * B, 16)    # s-major rows

    return cnn_fused(p_in, kp["cw1p"], kp["cb1p"], kp["cw2p"], kp["cb2p"],
                     kp["fw1"], kp["fb1"], kp["fw2"], kp["fb2"])      # (B, 1)


def ref_forward(x_ncl, p):
    """Pure-JAX reference mirroring the PyTorch forward (NCW layout)."""
    def conv1d(x, w, b):       # x (B,Cin,L), w (3,Cin,Cout), b (1,Cout)
        Bb, Cin, L = x.shape
        xp = jnp.pad(x, ((0, 0), (0, 0), (1, 1)))
        out = jnp.zeros((Bb, w.shape[2], L), jnp.float32)
        for k in range(3):
            out = out + jnp.einsum("bil,io->bol", xp[:, :, k:k + L], w[k])
        return out + b[0][None, :, None]

    def pool(x):               # MaxPool1d(kernel=2, stride=2) on (B,C,L)
        Bb, C, L = x.shape
        return jnp.max(x.reshape(Bb, C, L // 2, 2), axis=-1)

    h = pool(jax.nn.relu(conv1d(x_ncl, p["cw1"], p["cb1"])))
    h = pool(jax.nn.relu(conv1d(h, p["cw2"], p["cb2"])))
    flat = h.reshape(x_ncl.shape[0], C2 * S)
    h = jax.nn.relu(flat @ p["fw1"] + p["fb1"])
    return h @ p["fw2"] + p["fb2"]


if __name__ == "__main__":
    key = jax.random.PRNGKey(0)
    pkey, xkey = jax.random.split(key)
    params = init_params(pkey)
    kparams = prepare_params(params)          # host-side, once
    # Input length 244 is dictated by fc1's 32*61 input features.
    x = jax.random.normal(xkey, (2, 1, L_IN), jnp.float32)   # batch=2, NCW
    out = jax.block_until_ready(cnn_forward(x, kparams))
    ref = ref_forward(x, params)
    assert out.shape == (2, 1), out.shape
    # fc1 runs bf16 x bf16 in-kernel (activations rounded to bf16), so allow a
    # slightly looser tolerance than pure f32.
    assert jnp.allclose(out, ref, atol=2e-3, rtol=2e-2), (out, ref)
    print("KERNEL_OK")
</pallas_src>

<mosaic_0001>
module attributes {stable_mosaic.version = 11 : i64} {
  func.func @_cnn_kernel(%arg0: memref<122x16xf32, #tpu.memory_space<vmem>>, %arg1: memref<16x128xf32, #tpu.memory_space<vmem>>, %arg2: memref<1x128xf32, #tpu.memory_space<vmem>>, %arg3: memref<64x64xf32, #tpu.memory_space<vmem>>, %arg4: memref<1x64xf32, #tpu.memory_space<vmem>>, %arg5: memref<1952x128xbf16, #tpu.memory_space<any>>, %arg6: memref<1x128xf32, #tpu.memory_space<vmem>>, %arg7: memref<1x128xf32, #tpu.memory_space<vmem>>, %arg8: memref<1x1xf32, #tpu.memory_space<vmem>>, %arg9: memref<2x1xf32, #tpu.memory_space<vmem>>, %arg10: memref<1952x128xbf16, #tpu.memory_space<vmem>>, %arg11: memref<!tpu.dma_semaphore, #tpu.memory_space<semaphore_mem>>, %arg12: memref<122x32xf32, #tpu.memory_space<vmem>>, %arg13: memref<2x1952xf32, #tpu.memory_space<vmem>>) attributes {dimension_semantics = [], scalar_prefetch = 0 : i64, scratch_operands = 4 : i64, tpu.core_type = #tpu.core_type<tc>} {
    tpu.enqueue_dma source(%arg5 : memref<1952x128xbf16, #tpu.memory_space<any>>) target(%arg10 : memref<1952x128xbf16, #tpu.memory_space<vmem>>) target_semaphore(%arg11 : memref<!tpu.dma_semaphore, #tpu.memory_space<semaphore_mem>>)
    %c0 = arith.constant 0 : index
    %c0_0 = arith.constant 0 : index
    %0 = vector.load %arg0[%c0, %c0_0] : memref<122x16xf32, #tpu.memory_space<vmem>>, vector<122x16xf32>
    %c0_1 = arith.constant 0 : index
    %c0_2 = arith.constant 0 : index
    %1 = vector.load %arg1[%c0_1, %c0_2] : memref<16x128xf32, #tpu.memory_space<vmem>>, vector<16x128xf32>
    %cst = arith.constant dense<0.000000e+00> : vector<122x128xf32>
    %2 = tpu.matmul %0, %1, %cst {dimension_numbers = #tpu.dot_dimension_numbers<[1], [0], [0], [1], [0, 0, 1, 1], [], []>} : vector<122x16xf32>, vector<16x128xf32>, vector<122x128xf32> -> vector<122x128xf32>
    %c0_3 = arith.constant 0 : index
    %c0_4 = arith.constant 0 : index
    %3 = vector.load %arg2[%c0_3, %c0_4] : memref<1x128xf32, #tpu.memory_space<vmem>>, vector<1x128xf32>
    %4 = vector.broadcast %3 : vector<1x128xf32> to vector<122x128xf32>
    %5 = arith.addf %2, %4 : vector<122x128xf32>
    %6 = vector.extract_strided_slice %5 {offsets = [0, 0], sizes = [122, 64], strides = [1, 1]} : vector<122x128xf32> to vector<122x64xf32>
    %7 = vector.extract_strided_slice %5 {offsets = [0, 64], sizes = [122, 64], strides = [1, 1]} : vector<122x128xf32> to vector<122x64xf32>
    %8 = arith.maximumf %6, %7 : vector<122x64xf32>
    %cst_5 = arith.constant 0.000000e+00 : f32
    %9 = vector.broadcast %cst_5 : f32 to vector<122x64xf32>
    %10 = arith.maximumf %8, %9 : vector<122x64xf32>
    %11 = tpu.iota {dimensions = array<i32: 0>} : vector<122x64xi32>
    %12 = tpu.iota {dimensions = array<i32: 1>} : vector<122x64xi32>
    %c16_i32 = arith.constant 16 : i32
    %13 = vector.broadcast %c16_i32 : i32 to vector<122x64xi32>
    %14 = arith.cmpi slt, %12, %13 : vector<122x64xi32>
    %c2_i32 = arith.constant 2 : i32
    %15 = vector.broadcast %c2_i32 : i32 to vector<122x64xi32>
    %16 = arith.cmpi slt, %11, %15 : vector<122x64xi32>
    %17 = arith.andi %14, %16 : vector<122x64xi1>
    %c48_i32 = arith.constant 48 : i32
    %18 = vector.broadcast %c48_i32 : i32 to vector<122x64xi32>
    %19 = arith.cmpi sge, %12, %18 : vector<122x64xi32>
    %c120_i32 = arith.constant 120 : i32
    %20 = vector.broadcast %c120_i32 : i32 to vector<122x64xi32>
    %21 = arith.cmpi sge, %11, %20 : vector<122x64xi32>
    %22 = arith.andi %19, %21 : vector<122x64xi1>
    %23 = arith.ori %17, %22 : vector<122x64xi1>
    %cst_6 = arith.constant 0.000000e+00 : f32
    %24 = vector.broadcast %cst_6 : f32 to vector<122x64xf32>
    %25 = arith.select %23, %24, %10 : vector<122x64xi1>, vector<122x64xf32>
    %c0_7 = arith.constant 0 : index
    %c0_8 = arith.constant 0 : index
    %26 = vector.load %arg3[%c0_7, %c0_8] : memref<64x64xf32, #tpu.memory_space<vmem>>, vector<64x64xf32>
    %cst_9 = arith.constant dense<0.000000e+00> : vector<122x64xf32>
    %27 = tpu.matmul %25, %26, %cst_9 {dimension_numbers = #tpu.dot_dimension_numbers<[1], [0], [0], [1], [0, 0, 1, 1], [], []>} : vector<122x64xf32>, vector<64x64xf32>, vector<122x64xf32> -> vector<122x64xf32>
    %c0_10 = arith.constant 0 : index
    %c0_11 = arith.constant 0 : index
    %28 = vector.load %arg4[%c0_10, %c0_11] : memref<1x64xf32, #tpu.memory_space<vmem>>, vector<1x64xf32>
    %29 = vector.broadcast %28 : vector<1x64xf32> to vector<122x64xf32>
    %30 = arith.addf %27, %29 : vector<122x64xf32>
    %31 = vector.extract_strided_slice %30 {offsets = [0, 0], sizes = [122, 32], strides = [1, 1]} : vector<122x64xf32> to vector<122x32xf32>
    %32 = vector.extract_strided_slice %30 {offsets = [0, 32], sizes = [122, 32], strides = [1, 1]} : vector<122x64xf32> to vector<122x32xf32>
    %33 = arith.maximumf %31, %32 : vector<122x32xf32>
    %cst_12 = arith.constant 0.000000e+00 : f32
    %34 = vector.broadcast %cst_12 : f32 to vector<122x32xf32>
    %35 = arith.maximumf %33, %34 : vector<122x32xf32>
    %c0_13 = arith.constant 0 : index
    %c0_14 = arith.constant 0 : index
    %36 = vector.load %arg12[%c0_13, %c0_14] : memref<122x32xf32, #tpu.memory_space<vmem>>, vector<122x32xf32>
    tpu.vector_store %arg12[%c0_13, %c0_14], %35 {strides = array<i32>} : memref<122x32xf32, #tpu.memory_space<vmem>>, vector<122x32xf32>,
    %c0_15 = arith.constant 0 : index
    %c0_16 = arith.constant 0 : index
    %37 = vector.load %arg12[%c0_15, %c0_16] : memref<122x32xf32, #tpu.memory_space<vmem>>, vector<2x32xf32>
    %c0_17 = arith.constant 0 : index
    %c0_18 = arith.constant 0 : index
    %38 = vector.load %arg13[%c0_17, %c0_18] : memref<2x1952xf32, #tpu.memory_space<vmem>>, vector<2x32xf32>
    tpu.vector_store %arg13[%c0_17, %c0_18], %37 {strides = array<i32>} : memref<2x1952xf32, #tpu.memory_space<vmem>>, vector<2x32xf32>,
    %c2 = arith.constant 2 : index
    %c0_19 = arith.constant 0 : index
    %39 = vector.load %arg12[%c2, %c0_19] : memref<122x32xf32, #tpu.memory_space<vmem>>, vector<2x32xf32>
    %c0_20 = arith.constant 0 : index
    %c32 = arith.constant 32 : index
    %40 = vector.load %arg13[%c0_20, %c32] : memref<2x1952xf32, #tpu.memory_space<vmem>>, vector<2x32xf32>
    tpu.vector_store %arg13[%c0_20, %c32], %39 {strides = array<i32>} : memref<2x1952xf32, #tpu.memory_space<vmem>>, vector<2x32xf32>,
    %c4 = arith.constant 4 : index
    %c0_21 = arith.constant 0 : index
    %41 = vector.load %arg12[%c4, %c0_21] : memref<122x32xf32, #tpu.memory_space<vmem>>, vector<2x32xf32>
    %c0_22 = arith.constant 0 : index
    %c64 = arith.constant 64 : index
    %42 = vector.load %arg13[%c0_22, %c64] : memref<2x1952xf32, #tpu.memory_space<vmem>>, vector<2x32xf32>
    tpu.vector_store %arg13[%c0_22, %c64], %41 {strides = array<i32>} : memref<2x1952xf32, #tpu.memory_space<vmem>>, vector<2x32xf32>,
    %c6 = arith.constant 6 : index
    %c0_23 = arith.constant 0 : index
    %43 = vector.load %arg12[%c6, %c0_23] : memref<122x32xf32, #tpu.memory_space<vmem>>, vector<2x32xf32>
    %c0_24 = arith.constant 0 : index
    %c96 = arith.constant 96 : index
    %44 = vector.load %arg13[%c0_24, %c96] : memref<2x1952xf32, #tpu.memory_space<vmem>>, vector<2x32xf32>
    tpu.vector_store %arg13[%c0_24, %c96], %43 {strides = array<i32>} : memref<2x1952xf32, #tpu.memory_space<vmem>>, vector<2x32xf32>,
    %c8 = arith.constant 8 : index
    %c0_25 = arith.constant 0 : index
    %45 = vector.load %arg12[%c8, %c0_25] : memref<122x32xf32, #tpu.memory_space<vmem>>, vector<2x32xf32>
    %c0_26 = arith.constant 0 : index
    %c128 = arith.constant 128 : index
    %46 = vector.load %arg13[%c0_26, %c128] : memref<2x1952xf32, #tpu.memory_space<vmem>>, vector<2x32xf32>
    tpu.vector_store %arg13[%c0_26, %c128], %45 {strides = array<i32>} : memref<2x1952xf32, #tpu.memory_space<vmem>>, vector<2x32xf32>,
    %c10 = arith.constant 10 : index
    %c0_27 = arith.constant 0 : index
    %47 = vector.load %arg12[%c10, %c0_27] : memref<122x32xf32, #tpu.memory_space<vmem>>, vector<2x32xf32>
    %c0_28 = arith.constant 0 : index
    %c160 = arith.constant 160 : index
    %48 = vector.load %arg13[%c0_28, %c160] : memref<2x1952xf32, #tpu.memory_space<vmem>>, vector<2x32xf32>
    tpu.vector_store %arg13[%c0_28, %c160], %47 {strides = array<i32>} : memref<2x1952xf32, #tpu.memory_space<vmem>>, vector<2x32xf32>,
    %c12 = arith.constant 12 : index
    %c0_29 = arith.constant 0 : index
    %49 = vector.load %arg12[%c12, %c0_29] : memref<122x32xf32, #tpu.memory_space<vmem>>, vector<2x32xf32>
    %c0_30 = arith.constant 0 : index
    %c192 = arith.constant 192 : index
    %50 = vector.load %arg13[%c0_30, %c192] : memref<2x1952xf32, #tpu.memory_space<vmem>>, vector<2x32xf32>
    tpu.vector_store %arg13[%c0_30, %c192], %49 {strides = array<i32>} : memref<2x1952xf32, #tpu.memory_space<vmem>>, vector<2x32xf32>,
    %c14 = arith.constant 14 : index
    %c0_31 = arith.constant 0 : index
    %51 = vector.load %arg12[%c14, %c0_31] : memref<122x32xf32, #tpu.memory_space<vmem>>, vector<2x32xf32>
    %c0_32 = arith.constant 0 : index
    %c224 = arith.constant 224 : index
    %52 = vector.load %arg13[%c0_32, %c224] : memref<2x1952xf32, #tpu.memory_space<vmem>>, vector<2x32xf32>
    tpu.vector_store %arg13[%c0_32, %c224], %51 {strides = array<i32>} : memref<2x1952xf32, #tpu.memory_space<vmem>>, vector<2x32xf32>,
    %c16 = arith.constant 16 : index
    %c0_33 = arith.constant 0 : index
    %53 = vector.load %arg12[%c16, %c0_33] : memref<122x32xf32, #tpu.memory_space<vmem>>, vector<2x32xf32>
    %c0_34 = arith.constant 0 : index
    %c256 = arith.constant 256 : index
    %54 = vector.load %arg13[%c0_34, %c256] : memref<2x1952xf32, #tpu.memory_space<vmem>>, vector<2x32xf32>
    tpu.vector_store %arg13[%c0_34, %c256], %53 {strides = array<i32>} : memref<2x1952xf32, #tpu.memory_space<vmem>>, vector<2x32xf32>,
    %c18 = arith.constant 18 : index
    %c0_35 = arith.constant 0 : index
    %55 = vector.load %arg12[%c18, %c0_35] : memref<122x32xf32, #tpu.memory_space<vmem>>, vector<2x32xf32>
    %c0_36 = arith.constant 0 : index
    %c288 = arith.constant 288 : index
    %56 = vector.load %arg13[%c0_36, %c288] : memref<2x1952xf32, #tpu.memory_space<vmem>>, vector<2x32xf32>
    tpu.vector_store %arg13[%c0_36, %c288], %55 {strides = array<i32>} : memref<2x1952xf32, #tpu.memory_space<vmem>>, vector<2x32xf32>,
    %c20 = arith.constant 20 : index
    %c0_37 = arith.constant 0 : index
    %57 = vector.load %arg12[%c20, %c0_37] : memref<122x32xf32, #tpu.memory_space<vmem>>, vector<2x32xf32>
    %c0_38 = arith.constant 0 : index
    %c320 = arith.constant 320 : index
    %58 = vector.load %arg13[%c0_38, %c320] : memref<2x1952xf32, #tpu.memory_space<vmem>>, vector<2x32xf32>
    tpu.vector_store %arg13[%c0_38, %c320], %57 {strides = array<i32>} : memref<2x1952xf32, #tpu.memory_space<vmem>>, vector<2x32xf32>,
    %c22 = arith.constant 22 : index
    %c0_39 = arith.constant 0 : index
    %59 = vector.load %arg12[%c22, %c0_39] : memref<122x32xf32, #tpu.memory_space<vmem>>, vector<2x32xf32>
    %c0_40 = arith.constant 0 : index
    %c352 = arith.constant 352 : index
    %60 = vector.load %arg13[%c0_40, %c352] : memref<2x1952xf32, #tpu.memory_space<vmem>>, vector<2x32xf32>
    tpu.vector_store %arg13[%c0_40, %c352], %59 {strides = array<i32>} : memref<2x1952xf32, #tpu.memory_space<vmem>>, vector<2x32xf32>,
    %c24 = arith.constant 24 : index
    %c0_41 = arith.constant 0 : index
    %61 = vector.load %arg12[%c24, %c0_41] : memref<122x32xf32, #tpu.memory_space<vmem>>, vector<2x32xf32>
    %c0_42 = arith.constant 0 : index
    %c384 = arith.constant 384 : index
    %62 = vector.load %arg13[%c0_42, %c384] : memref<2x1952xf32, #tpu.memory_space<vmem>>, vector<2x32xf32>
    tpu.vector_store %arg13[%c0_42, %c384], %61 {strides = array<i32>} : memref<2x1952xf32, #tpu.memory_space<vmem>>, vector<2x32xf32>,
    %c26 = arith.constant 26 : index
    %c0_43 = arith.constant 0 : index
    %63 = vector.load %arg12[%c26, %c0_43] : memref<122x32xf32, #tpu.memory_space<vmem>>, vector<2x32xf32>
    %c0_44 = arith.constant 0 : index
    %c416 = arith.constant 416 : index
    %64 = vector.load %arg13[%c0_44, %c416] : memref<2x1952xf32, #tpu.memory_space<vmem>>, vector<2x32xf32>
    tpu.vector_store %arg13[%c0_44, %c416], %63 {strides = array<i32>} : memref<2x1952xf32, #tpu.memory_space<vmem>>, vector<2x32xf32>,
    %c28 = arith.constant 28 : index
    %c0_45 = arith.constant 0 : index
    %65 = vector.load %arg12[%c28, %c0_45] : memref<122x32xf32, #tpu.memory_space<vmem>>, vector<2x32xf32>
    %c0_46 = arith.constant 0 : index
    %c448 = arith.constant 448 : index
    %66 = vector.load %arg13[%c0_46, %c448] : memref<2x1952xf32, #tpu.memory_space<vmem>>, vector<2x32xf32>
    tpu.vector_store %arg13[%c0_46, %c448], %65 {strides = array<i32>} : memref<2x1952xf32, #tpu.memory_space<vmem>>, vector<2x32xf32>,
    %c30 = arith.constant 30 : index
    %c0_47 = arith.constant 0 : index
    %67 = vector.load %arg12[%c30, %c0_47] : memref<122x32xf32, #tpu.memory_space<vmem>>, vector<2x32xf32>
    %c0_48 = arith.constant 0 : index
    %c480 = arith.constant 480 : index
    %68 = vector.load %arg13[%c0_48, %c480] : memref<2x1952xf32, #tpu.memory_space<vmem>>, vector<2x32xf32>
    tpu.vector_store %arg13[%c0_48, %c480], %67 {strides = array<i32>} : memref<2x1952xf32, #tpu.memory_space<vmem>>, vector<2x32xf32>,
    %c32_49 = arith.constant 32 : index
    %c0_50 = arith.constant 0 : index
    %69 = vector.load %arg12[%c32_49, %c0_50] : memref<122x32xf32, #tpu.memory_space<vmem>>, vector<2x32xf32>
    %c0_51 = arith.constant 0 : index
    %c512 = arith.constant 512 : index
    %70 = vector.load %arg13[%c0_51, %c512] : memref<2x1952xf32, #tpu.memory_space<vmem>>, vector<2x32xf32>
    tpu.vector_store %arg13[%c0_51, %c512], %69 {strides = array<i32>} : memref<2x1952xf32, #tpu.memory_space<vmem>>, vector<2x32xf32>,
    %c34 = arith.constant 34 : index
    %c0_52 = arith.constant 0 : index
    %71 = vector.load %arg12[%c34, %c0_52] : memref<122x32xf32, #tpu.memory_space<vmem>>, vector<2x32xf32>
    %c0_53 = arith.constant 0 : index
    %c544 = arith.constant 544 : index
    %72 = vector.load %arg13[%c0_53, %c544] : memref<2x1952xf32, #tpu.memory_space<vmem>>, vector<2x32xf32>
    tpu.vector_store %arg13[%c0_53, %c544], %71 {strides = array<i32>} : memref<2x1952xf32, #tpu.memory_space<vmem>>, vector<2x32xf32>,
    %c36 = arith.constant 36 : index
    %c0_54 = arith.constant 0 : index
    %73 = vector.load %arg12[%c36, %c0_54] : memref<122x32xf32, #tpu.memory_space<vmem>>, vector<2x32xf32>
    %c0_55 = arith.constant 0 : index
    %c576 = arith.constant 576 : index
    %74 = vector.load %arg13[%c0_55, %c576] : memref<2x1952xf32, #tpu.memory_space<vmem>>, vector<2x32xf32>
    tpu.vector_store %arg13[%c0_55, %c576], %73 {strides = array<i32>} : memref<2x1952xf32, #tpu.memory_space<vmem>>, vector<2x32xf32>,
    %c38 = arith.constant 38 : index
    %c0_56 = arith.constant 0 : index
    %75 = vector.load %arg12[%c38, %c0_56] : memref<122x32xf32, #tpu.memory_space<vmem>>, vector<2x32xf32>
    %c0_57 = arith.constant 0 : index
    %c608 = arith.constant 608 : index
    %76 = vector.load %arg13[%c0_57, %c608] : memref<2x1952xf32, #tpu.memory_space<vmem>>, vector<2x32xf32>
    tpu.vector_store %arg13[%c0_57, %c608], %75 {strides = array<i32>} : memref<2x1952xf32, #tpu.memory_space<vmem>>, vector<2x32xf32>,
    %c40 = arith.constant 40 : index
    %c0_58 = arith.constant 0 : index
    %77 = vector.load %arg12[%c40, %c0_58] : memref<122x32xf32, #tpu.memory_space<vmem>>, vector<2x32xf32>
    %c0_59 = arith.constant 0 : index
    %c640 = arith.constant 640 : index
    %78 = vector.load %arg13[%c0_59, %c640] : memref<2x1952xf32, #tpu.memory_space<vmem>>, vector<2x32xf32>
    tpu.vector_store %arg13[%c0_59, %c640], %77 {strides = array<i32>} : memref<2x1952xf32, #tpu.memory_space<vmem>>, vector<2x32xf32>,
    %c42 = arith.constant 42 : index
    %c0_60 = arith.constant 0 : index
    %79 = vector.load %arg12[%c42, %c0_60] : memref<122x32xf32, #tpu.memory_space<vmem>>, vector<2x32xf32>
    %c0_61 = arith.constant 0 : index
    %c672 = arith.constant 672 : index
    %80 = vector.load %arg13[%c0_61, %c672] : memref<2x1952xf32, #tpu.memory_space<vmem>>, vector<2x32xf32>
    tpu.vector_store %arg13[%c0_61, %c672], %79 {strides = array<i32>} : memref<2x1952xf32, #tpu.memory_space<vmem>>, vector<2x32xf32>,
    %c44 = arith.constant 44 : index
    %c0_62 = arith.constant 0 : index
    %81 = vector.load %arg12[%c44, %c0_62] : memref<122x32xf32, #tpu.memory_space<vmem>>, vector<2x32xf32>
    %c0_63 = arith.constant 0 : index
    %c704 = arith.constant 704 : index
    %82 = vector.load %arg13[%c0_63, %c704] : memref<2x1952xf32, #tpu.memory_space<vmem>>, vector<2x32xf32>
    tpu.vector_store %arg13[%c0_63, %c704], %81 {strides = array<i32>} : memref<2x1952xf32, #tpu.memory_space<vmem>>, vector<2x32xf32>,
    %c46 = arith.constant 46 : index
    %c0_64 = arith.constant 0 : index
    %83 = vector.load %arg12[%c46, %c0_64] : memref<122x32xf32, #tpu.memory_space<vmem>>, vector<2x32xf32>
    %c0_65 = arith.constant 0 : index
    %c736 = arith.constant 736 : index
    %84 = vector.load %arg13[%c0_65, %c736] : memref<2x1952xf32, #tpu.memory_space<vmem>>, vector<2x32xf32>
    tpu.vector_store %arg13[%c0_65, %c736], %83 {strides = array<i32>} : memref<2x1952xf32, #tpu.memory_space<vmem>>, vector<2x32xf32>,
    %c48 = arith.constant 48 : index
    %c0_66 = arith.constant 0 : index
    %85 = vector.load %arg12[%c48, %c0_66] : memref<122x32xf32, #tpu.memory_space<vmem>>, vector<2x32xf32>
    %c0_67 = arith.constant 0 : index
    %c768 = arith.constant 768 : index
    %86 = vector.load %arg13[%c0_67, %c768] : memref<2x1952xf32, #tpu.memory_space<vmem>>, vector<2x32xf32>
    tpu.vector_store %arg13[%c0_67, %c768], %85 {strides = array<i32>} : memref<2x1952xf32, #tpu.memory_space<vmem>>, vector<2x32xf32>,
    %c50 = arith.constant 50 : index
    %c0_68 = arith.constant 0 : index
    %87 = vector.load %arg12[%c50, %c0_68] : memref<122x32xf32, #tpu.memory_space<vmem>>, vector<2x32xf32>
    %c0_69 = arith.constant 0 : index
    %c800 = arith.constant 800 : index
    %88 = vector.load %arg13[%c0_69, %c800] : memref<2x1952xf32, #tpu.memory_space<vmem>>, vector<2x32xf32>
    tpu.vector_store %arg13[%c0_69, %c800], %87 {strides = array<i32>} : memref<2x1952xf32, #tpu.memory_space<vmem>>, vector<2x32xf32>,
    %c52 = arith.constant 52 : index
    %c0_70 = arith.constant 0 : index
    %89 = vector.load %arg12[%c52, %c0_70] : memref<122x32xf32, #tpu.memory_space<vmem>>, vector<2x32xf32>
    %c0_71 = arith.constant 0 : index
    %c832 = arith.constant 832 : index
    %90 = vector.load %arg13[%c0_71, %c832] : memref<2x1952xf32, #tpu.memory_space<vmem>>, vector<2x32xf32>
    tpu.vector_store %arg13[%c0_71, %c832], %89 {strides = array<i32>} : memref<2x1952xf32, #tpu.memory_space<vmem>>, vector<2x32xf32>,
    %c54 = arith.constant 54 : index
    %c0_72 = arith.constant 0 : index
    %91 = vector.load %arg12[%c54, %c0_72] : memref<122x32xf32, #tpu.memory_space<vmem>>, vector<2x32xf32>
    %c0_73 = arith.constant 0 : index
    %c864 = arith.constant 864 : index
    %92 = vector.load %arg13[%c0_73, %c864] : memref<2x1952xf32, #tpu.memory_space<vmem>>, vector<2x32xf32>
    tpu.vector_store %arg13[%c0_73, %c864], %91 {strides = array<i32>} : memref<2x1952xf32, #tpu.memory_space<vmem>>, vector<2x32xf32>,
    %c56 = arith.constant 56 : index
    %c0_74 = arith.constant 0 : index
    %93 = vector.load %arg12[%c56, %c0_74] : memref<122x32xf32, #tpu.memory_space<vmem>>, vector<2x32xf32>
    %c0_75 = arith.constant 0 : index
    %c896 = arith.constant 896 : index
    %94 = vector.load %arg13[%c0_75, %c896] : memref<2x1952xf32, #tpu.memory_space<vmem>>, vector<2x32xf32>
    tpu.vector_store %arg13[%c0_75, %c896], %93 {strides = array<i32>} : memref<2x1952xf32, #tpu.memory_space<vmem>>, vector<2x32xf32>,
    %c58 = arith.constant 58 : index
    %c0_76 = arith.constant 0 : index
    %95 = vector.load %arg12[%c58, %c0_76] : memref<122x32xf32, #tpu.memory_space<vmem>>, vector<2x32xf32>
    %c0_77 = arith.constant 0 : index
    %c928 = arith.constant 928 : index
    %96 = vector.load %arg13[%c0_77, %c928] : memref<2x1952xf32, #tpu.memory_space<vmem>>, vector<2x32xf32>
    tpu.vector_store %arg13[%c0_77, %c928], %95 {strides = array<i32>} : memref<2x1952xf32, #tpu.memory_space<vmem>>, vector<2x32xf32>,
    %c60 = arith.constant 60 : index
    %c0_78 = arith.constant 0 : index
    %97 = vector.load %arg12[%c60, %c0_78] : memref<122x32xf32, #tpu.memory_space<vmem>>, vector<2x32xf32>
    %c0_79 = arith.constant 0 : index
    %c960 = arith.constant 960 : index
    %98 = vector.load %arg13[%c0_79, %c960] : memref<2x1952xf32, #tpu.memory_space<vmem>>, vector<2x32xf32>
    tpu.vector_store %arg13[%c0_79, %c960], %97 {strides = array<i32>} : memref<2x1952xf32, #tpu.memory_space<vmem>>, vector<2x32xf32>,
    %c62 = arith.constant 62 : index
    %c0_80 = arith.constant 0 : index
    %99 = vector.load %arg12[%c62, %c0_80] : memref<122x32xf32, #tpu.memory_space<vmem>>, vector<2x32xf32>
    %c0_81 = arith.constant 0 : index
    %c992 = arith.constant 992 : index
    %100 = vector.load %arg13[%c0_81, %c992] : memref<2x1952xf32, #tpu.memory_space<vmem>>, vector<2x32xf32>
    tpu.vector_store %arg13[%c0_81, %c992], %99 {strides = array<i32>} : memref<2x1952xf32, #tpu.memory_space<vmem>>, vector<2x32xf32>,
    %c64_82 = arith.constant 64 : index
    %c0_83 = arith.constant 0 : index
    %101 = vector.load %arg12[%c64_82, %c0_83] : memref<122x32xf32, #tpu.memory_space<vmem>>, vector<2x32xf32>
    %c0_84 = arith.constant 0 : index
    %c1024 = arith.constant 1024 : index
    %102 = vector.load %arg13[%c0_84, %c1024] : memref<2x1952xf32, #tpu.memory_space<vmem>>, vector<2x32xf32>
    tpu.vector_store %arg13[%c0_84, %c1024], %101 {strides = array<i32>} : memref<2x1952xf32, #tpu.memory_space<vmem>>, vector<2x32xf32>,
    %c66 = arith.constant 66 : index
    %c0_85 = arith.constant 0 : index
    %103 = vector.load %arg12[%c66, %c0_85] : memref<122x32xf32, #tpu.memory_space<vmem>>, vector<2x32xf32>
    %c0_86 = arith.constant 0 : index
    %c1056 = arith.constant 1056 : index
    %104 = vector.load %arg13[%c0_86, %c1056] : memref<2x1952xf32, #tpu.memory_space<vmem>>, vector<2x32xf32>
    tpu.vector_store %arg13[%c0_86, %c1056], %103 {strides = array<i32>} : memref<2x1952xf32, #tpu.memory_space<vmem>>, vector<2x32xf32>,
    %c68 = arith.constant 68 : index
    %c0_87 = arith.constant 0 : index
    %105 = vector.load %arg12[%c68, %c0_87] : memref<122x32xf32, #tpu.memory_space<vmem>>, vector<2x32xf32>
    %c0_88 = arith.constant 0 : index
    %c1088 = arith.constant 1088 : index
    %106 = vector.load %arg13[%c0_88, %c1088] : memref<2x1952xf32, #tpu.memory_space<vmem>>, vector<2x32xf32>
    tpu.vector_store %arg13[%c0_88, %c1088], %105 {strides = array<i32>} : memref<2x1952xf32, #tpu.memory_space<vmem>>, vector<2x32xf32>,
    %c70 = arith.constant 70 : index
    %c0_89 = arith.constant 0 : index
    %107 = vector.load %arg12[%c70, %c0_89] : memref<122x32xf32, #tpu.memory_space<vmem>>, vector<2x32xf32>
    %c0_90 = arith.constant 0 : index
    %c1120 = arith.constant 1120 : index
    %108 = vector.load %arg13[%c0_90, %c1120] : memref<2x1952xf32, #tpu.memory_space<vmem>>, vector<2x32xf32>
    tpu.vector_store %arg13[%c0_90, %c1120], %107 {strides = array<i32>} : memref<2x1952xf32, #tpu.memory_space<vmem>>, vector<2x32xf32>,
    %c72 = arith.constant 72 : index
    %c0_91 = arith.constant 0 : index
    %109 = vector.load %arg12[%c72, %c0_91] : memref<122x32xf32, #tpu.memory_space<vmem>>, vector<2x32xf32>
    %c0_92 = arith.constant 0 : index
    %c1152 = arith.constant 1152 : index
    %110 = vector.load %arg13[%c0_92, %c1152] : memref<2x1952xf32, #tpu.memory_space<vmem>>, vector<2x32xf32>
    tpu.vector_store %arg13[%c0_92, %c1152], %109 {strides = array<i32>} : memref<2x1952xf32, #tpu.memory_space<vmem>>, vector<2x32xf32>,
    %c74 = arith.constant 74 : index
    %c0_93 = arith.constant 0 : index
    %111 = vector.load %arg12[%c74, %c0_93] : memref<122x32xf32, #tpu.memory_space<vmem>>, vector<2x32xf32>
    %c0_94 = arith.constant 0 : index
    %c1184 = arith.constant 1184 : index
    %112 = vector.load %arg13[%c0_94, %c1184] : memref<2x1952xf32, #tpu.memory_space<vmem>>, vector<2x32xf32>
    tpu.vector_store %arg13[%c0_94, %c1184], %111 {strides = array<i32>} : memref<2x1952xf32, #tpu.memory_space<vmem>>, vector<2x32xf32>,
    %c76 = arith.constant 76 : index
    %c0_95 = arith.constant 0 : index
    %113 = vector.load %arg12[%c76, %c0_95] : memref<122x32xf32, #tpu.memory_space<vmem>>, vector<2x32xf32>
    %c0_96 = arith.constant 0 : index
    %c1216 = arith.constant 1216 : index
    %114 = vector.load %arg13[%c0_96, %c1216] : memref<2x1952xf32, #tpu.memory_space<vmem>>, vector<2x32xf32>
    tpu.vector_store %arg13[%c0_96, %c1216], %113 {strides = array<i32>} : memref<2x1952xf32, #tpu.memory_space<vmem>>, vector<2x32xf32>,
    %c78 = arith.constant 78 : index
    %c0_97 = arith.constant 0 : index
    %115 = vector.load %arg12[%c78, %c0_97] : memref<122x32xf32, #tpu.memory_space<vmem>>, vector<2x32xf32>
    %c0_98 = arith.constant 0 : index
    %c1248 = arith.constant 1248 : index
    %116 = vector.load %arg13[%c0_98, %c1248] : memref<2x1952xf32, #tpu.memory_space<vmem>>, vector<2x32xf32>
    tpu.vector_store %arg13[%c0_98, %c1248], %115 {strides = array<i32>} : memref<2x1952xf32, #tpu.memory_space<vmem>>, vector<2x32xf32>,
    %c80 = arith.constant 80 : index
    %c0_99 = arith.constant 0 : index
    %117 = vector.load %arg12[%c80, %c0_99] : memref<122x32xf32, #tpu.memory_space<vmem>>, vector<2x32xf32>
    %c0_100 = arith.constant 0 : index
    %c1280 = arith.constant 1280 : index
    %118 = vector.load %arg13[%c0_100, %c1280] : memref<2x1952xf32, #tpu.memory_space<vmem>>, vector<2x32xf32>
    tpu.vector_store %arg13[%c0_100, %c1280], %117 {strides = array<i32>} : memref<2x1952xf32, #tpu.memory_space<vmem>>, vector<2x32xf32>,
    %c82 = arith.constant 82 : index
    %c0_101 = arith.constant 0 : index
    %119 = vector.load %arg12[%c82, %c0_101] : memref<122x32xf32, #tpu.memory_space<vmem>>, vector<2x32xf32>
    %c0_102 = arith.constant 0 : index
    %c1312 = arith.constant 1312 : index
    %120 = vector.load %arg13[%c0_102, %c1312] : memref<2x1952xf32, #tpu.memory_space<vmem>>, vector<2x32xf32>
    tpu.vector_store %arg13[%c0_102, %c1312], %119 {strides = array<i32>} : memref<2x1952xf32, #tpu.memory_space<vmem>>, vector<2x32xf32>,
    %c84 = arith.constant 84 : index
    %c0_103 = arith.constant 0 : index
    %121 = vector.load %arg12[%c84, %c0_103] : memref<122x32xf32, #tpu.memory_space<vmem>>, vector<2x32xf32>
    %c0_104 = arith.constant 0 : index
    %c1344 = arith.constant 1344 : index
    %122 = vector.load %arg13[%c0_104, %c1344] : memref<2x1952xf32, #tpu.memory_space<vmem>>, vector<2x32xf32>
    tpu.vector_store %arg13[%c0_104, %c1344], %121 {strides = array<i32>} : memref<2x1952xf32, #tpu.memory_space<vmem>>, vector<2x32xf32>,
    %c86 = arith.constant 86 : index
    %c0_105 = arith.constant 0 : index
    %123 = vector.load %arg12[%c86, %c0_105] : memref<122x32xf32, #tpu.memory_space<vmem>>, vector<2x32xf32>
    %c0_106 = arith.constant 0 : index
    %c1376 = arith.constant 1376 : index
    %124 = vector.load %arg13[%c0_106, %c1376] : memref<2x1952xf32, #tpu.memory_space<vmem>>, vector<2x32xf32>
    tpu.vector_store %arg13[%c0_106, %c1376], %123 {strides = array<i32>} : memref<2x1952xf32, #tpu.memory_space<vmem>>, vector<2x32xf32>,
    %c88 = arith.constant 88 : index
    %c0_107 = arith.constant 0 : index
    %125 = vector.load %arg12[%c88, %c0_107] : memref<122x32xf32, #tpu.memory_space<vmem>>, vector<2x32xf32>
    %c0_108 = arith.constant 0 : index
    %c1408 = arith.constant 1408 : index
    %126 = vector.load %arg13[%c0_108, %c1408] : memref<2x1952xf32, #tpu.memory_space<vmem>>, vector<2x32xf32>
    tpu.vector_store %arg13[%c0_108, %c1408], %125 {strides = array<i32>} : memref<2x1952xf32, #tpu.memory_space<vmem>>, vector<2x32xf32>,
    %c90 = arith.constant 90 : index
    %c0_109 = arith.constant 0 : index
    %127 = vector.load %arg12[%c90, %c0_109] : memref<122x32xf32, #tpu.memory_space<vmem>>, vector<2x32xf32>
    %c0_110 = arith.constant 0 : index
    %c1440 = arith.constant 1440 : index
    %128 = vector.load %arg13[%c0_110, %c1440] : memref<2x1952xf32, #tpu.memory_space<vmem>>, vector<2x32xf32>
    tpu.vector_store %arg13[%c0_110, %c1440], %127 {strides = array<i32>} : memref<2x1952xf32, #tpu.memory_space<vmem>>, vector<2x32xf32>,
    %c92 = arith.constant 92 : index
    %c0_111 = arith.constant 0 : index
    %129 = vector.load %arg12[%c92, %c0_111] : memref<122x32xf32, #tpu.memory_space<vmem>>, vector<2x32xf32>
    %c0_112 = arith.constant 0 : index
    %c1472 = arith.constant 1472 : index
    %130 = vector.load %arg13[%c0_112, %c1472] : memref<2x1952xf32, #tpu.memory_space<vmem>>, vector<2x32xf32>
    tpu.vector_store %arg13[%c0_112, %c1472], %129 {strides = array<i32>} : memref<2x1952xf32, #tpu.memory_space<vmem>>, vector<2x32xf32>,
    %c94 = arith.constant 94 : index
    %c0_113 = arith.constant 0 : index
    %131 = vector.load %arg12[%c94, %c0_113] : memref<122x32xf32, #tpu.memory_space<vmem>>, vector<2x32xf32>
    %c0_114 = arith.constant 0 : index
    %c1504 = arith.constant 1504 : index
    %132 = vector.load %arg13[%c0_114, %c1504] : memref<2x1952xf32, #tpu.memory_space<vmem>>, vector<2x32xf32>
    tpu.vector_store %arg13[%c0_114, %c1504], %131 {strides = array<i32>} : memref<2x1952xf32, #tpu.memory_space<vmem>>, vector<2x32xf32>,
    %c96_115 = arith.constant 96 : index
    %c0_116 = arith.constant 0 : index
    %133 = vector.load %arg12[%c96_115, %c0_116] : memref<122x32xf32, #tpu.memory_space<vmem>>, vector<2x32xf32>
    %c0_117 = arith.constant 0 : index
    %c1536 = arith.constant 1536 : index
    %134 = vector.load %arg13[%c0_117, %c1536] : memref<2x1952xf32, #tpu.memory_space<vmem>>, vector<2x32xf32>
    tpu.vector_store %arg13[%c0_117, %c1536], %133 {strides = array<i32>} : memref<2x1952xf32, #tpu.memory_space<vmem>>, vector<2x32xf32>,
    %c98 = arith.constant 98 : index
    %c0_118 = arith.constant 0 : index
    %135 = vector.load %arg12[%c98, %c0_118] : memref<122x32xf32, #tpu.memory_space<vmem>>, vector<2x32xf32>
    %c0_119 = arith.constant 0 : index
    %c1568 = arith.constant 1568 : index
    %136 = vector.load %arg13[%c0_119, %c1568] : memref<2x1952xf32, #tpu.memory_space<vmem>>, vector<2x32xf32>
    tpu.vector_store %arg13[%c0_119, %c1568], %135 {strides = array<i32>} : memref<2x1952xf32, #tpu.memory_space<vmem>>, vector<2x32xf32>,
    %c100 = arith.constant 100 : index
    %c0_120 = arith.constant 0 : index
    %137 = vector.load %arg12[%c100, %c0_120] : memref<122x32xf32, #tpu.memory_space<vmem>>, vector<2x32xf32>
    %c0_121 = arith.constant 0 : index
    %c1600 = arith.constant 1600 : index
    %138 = vector.load %arg13[%c0_121, %c1600] : memref<2x1952xf32, #tpu.memory_space<vmem>>, vector<2x32xf32>
    tpu.vector_store %arg13[%c0_121, %c1600], %137 {strides = array<i32>} : memref<2x1952xf32, #tpu.memory_space<vmem>>, vector<2x32xf32>,
    %c102 = arith.constant 102 : index
    %c0_122 = arith.constant 0 : index
    %139 = vector.load %arg12[%c102, %c0_122] : memref<122x32xf32, #tpu.memory_space<vmem>>, vector<2x32xf32>
    %c0_123 = arith.constant 0 : index
    %c1632 = arith.constant 1632 : index
    %140 = vector.load %arg13[%c0_123, %c1632] : memref<2x1952xf32, #tpu.memory_space<vmem>>, vector<2x32xf32>
    tpu.vector_store %arg13[%c0_123, %c1632], %139 {strides = array<i32>} : memref<2x1952xf32, #tpu.memory_space<vmem>>, vector<2x32xf32>,
    %c104 = arith.constant 104 : index
    %c0_124 = arith.constant 0 : index
    %141 = vector.load %arg12[%c104, %c0_124] : memref<122x32xf32, #tpu.memory_space<vmem>>, vector<2x32xf32>
    %c0_125 = arith.constant 0 : index
    %c1664 = arith.constant 1664 : index
    %142 = vector.load %arg13[%c0_125, %c1664] : memref<2x1952xf32, #tpu.memory_space<vmem>>, vector<2x32xf32>
    tpu.vector_store %arg13[%c0_125, %c1664], %141 {strides = array<i32>} : memref<2x1952xf32, #tpu.memory_space<vmem>>, vector<2x32xf32>,
    %c106 = arith.constant 106 : index
    %c0_126 = arith.constant 0 : index
    %143 = vector.load %arg12[%c106, %c0_126] : memref<122x32xf32, #tpu.memory_space<vmem>>, vector<2x32xf32>
    %c0_127 = arith.constant 0 : index
    %c1696 = arith.constant 1696 : index
    %144 = vector.load %arg13[%c0_127, %c1696] : memref<2x1952xf32, #tpu.memory_space<vmem>>, vector<2x32xf32>
    tpu.vector_store %arg13[%c0_127, %c1696], %143 {strides = array<i32>} : memref<2x1952xf32, #tpu.memory_space<vmem>>, vector<2x32xf32>,
    %c108 = arith.constant 108 : index
    %c0_128 = arith.constant 0 : index
    %145 = vector.load %arg12[%c108, %c0_128] : memref<122x32xf32, #tpu.memory_space<vmem>>, vector<2x32xf32>
    %c0_129 = arith.constant 0 : index
    %c1728 = arith.constant 1728 : index
    %146 = vector.load %arg13[%c0_129, %c1728] : memref<2x1952xf32, #tpu.memory_space<vmem>>, vector<2x32xf32>
    tpu.vector_store %arg13[%c0_129, %c1728], %145 {strides = array<i32>} : memref<2x1952xf32, #tpu.memory_space<vmem>>, vector<2x32xf32>,
    %c110 = arith.constant 110 : index
    %c0_130 = arith.constant 0 : index
    %147 = vector.load %arg12[%c110, %c0_130] : memref<122x32xf32, #tpu.memory_space<vmem>>, vector<2x32xf32>
    %c0_131 = arith.constant 0 : index
    %c1760 = arith.constant 1760 : index
    %148 = vector.load %arg13[%c0_131, %c1760] : memref<2x1952xf32, #tpu.memory_space<vmem>>, vector<2x32xf32>
    tpu.vector_store %arg13[%c0_131, %c1760], %147 {strides = array<i32>} : memref<2x1952xf32, #tpu.memory_space<vmem>>, vector<2x32xf32>,
    %c112 = arith.constant 112 : index
    %c0_132 = arith.constant 0 : index
    %149 = vector.load %arg12[%c112, %c0_132] : memref<122x32xf32, #tpu.memory_space<vmem>>, vector<2x32xf32>
    %c0_133 = arith.constant 0 : index
    %c1792 = arith.constant 1792 : index
    %150 = vector.load %arg13[%c0_133, %c1792] : memref<2x1952xf32, #tpu.memory_space<vmem>>, vector<2x32xf32>
    tpu.vector_store %arg13[%c0_133, %c1792], %149 {strides = array<i32>} : memref<2x1952xf32, #tpu.memory_space<vmem>>, vector<2x32xf32>,
    %c114 = arith.constant 114 : index
    %c0_134 = arith.constant 0 : index
    %151 = vector.load %arg12[%c114, %c0_134] : memref<122x32xf32, #tpu.memory_space<vmem>>, vector<2x32xf32>
    %c0_135 = arith.constant 0 : index
    %c1824 = arith.constant 1824 : index
    %152 = vector.load %arg13[%c0_135, %c1824] : memref<2x1952xf32, #tpu.memory_space<vmem>>, vector<2x32xf32>
    tpu.vector_store %arg13[%c0_135, %c1824], %151 {strides = array<i32>} : memref<2x1952xf32, #tpu.memory_space<vmem>>, vector<2x32xf32>,
    %c116 = arith.constant 116 : index
    %c0_136 = arith.constant 0 : index
    %153 = vector.load %arg12[%c116, %c0_136] : memref<122x32xf32, #tpu.memory_space<vmem>>, vector<2x32xf32>
    %c0_137 = arith.constant 0 : index
    %c1856 = arith.constant 1856 : index
    %154 = vector.load %arg13[%c0_137, %c1856] : memref<2x1952xf32, #tpu.memory_space<vmem>>, vector<2x32xf32>
    tpu.vector_store %arg13[%c0_137, %c1856], %153 {strides = array<i32>} : memref<2x1952xf32, #tpu.memory_space<vmem>>, vector<2x32xf32>,
    %c118 = arith.constant 118 : index
    %c0_138 = arith.constant 0 : index
    %155 = vector.load %arg12[%c118, %c0_138] : memref<122x32xf32, #tpu.memory_space<vmem>>, vector<2x32xf32>
    %c0_139 = arith.constant 0 : index
    %c1888 = arith.constant 1888 : index
    %156 = vector.load %arg13[%c0_139, %c1888] : memref<2x1952xf32, #tpu.memory_space<vmem>>, vector<2x32xf32>
    tpu.vector_store %arg13[%c0_139, %c1888], %155 {strides = array<i32>} : memref<2x1952xf32, #tpu.memory_space<vmem>>, vector<2x32xf32>,
    %c120 = arith.constant 120 : index
    %c0_140 = arith.constant 0 : index
    %157 = vector.load %arg12[%c120, %c0_140] : memref<122x32xf32, #tpu.memory_space<vmem>>, vector<2x32xf32>
    %c0_141 = arith.constant 0 : index
    %c1920 = arith.constant 1920 : index
    %158 = vector.load %arg13[%c0_141, %c1920] : memref<2x1952xf32, #tpu.memory_space<vmem>>, vector<2x32xf32>
    tpu.vector_store %arg13[%c0_141, %c1920], %157 {strides = array<i32>} : memref<2x1952xf32, #tpu.memory_space<vmem>>, vector<2x32xf32>,
    tpu.wait_dma2 semaphore(%arg11 : memref<!tpu.dma_semaphore, #tpu.memory_space<semaphore_mem>>) src(%arg5 : memref<1952x128xbf16, #tpu.memory_space<any>>) dst(%arg10 : memref<1952x128xbf16, #tpu.memory_space<vmem>>)
    %c0_142 = arith.constant 0 : index
    %c0_143 = arith.constant 0 : index
    %159 = vector.load %arg13[%c0_142, %c0_143] : memref<2x1952xf32, #tpu.memory_space<vmem>>, vector<2x1952xf32>
    %160 = arith.truncf %159 : vector<2x1952xf32> to vector<2x1952xbf16>
    %c0_144 = arith.constant 0 : index
    %c0_145 = arith.constant 0 : index
    %161 = vector.load %arg10[%c0_144, %c0_145] : memref<1952x128xbf16, #tpu.memory_space<vmem>>, vector<1952x128xbf16>
    %cst_146 = arith.constant dense<0.000000e+00> : vector<2x128xf32>
    %162 = tpu.matmul %160, %161, %cst_146 {dimension_numbers = #tpu.dot_dimension_numbers<[1], [0], [0], [1], [0, 0, 1, 1], [], []>} : vector<2x1952xbf16>, vector<1952x128xbf16>, vector<2x128xf32> -> vector<2x128xf32>
    %c0_147 = arith.constant 0 : index
    %c0_148 = arith.constant 0 : index
    %163 = vector.load %arg6[%c0_147, %c0_148] : memref<1x128xf32, #tpu.memory_space<vmem>>, vector<1x128xf32>
    %164 = vector.broadcast %163 : vector<1x128xf32> to vector<2x128xf32>
    %165 = arith.addf %162, %164 : vector<2x128xf32>
    %cst_149 = arith.constant 0.000000e+00 : f32
    %166 = vector.broadcast %cst_149 : f32 to vector<2x128xf32>
    %167 = arith.maximumf %165, %166 : vector<2x128xf32>
    %c0_150 = arith.constant 0 : index
    %c0_151 = arith.constant 0 : index
    %168 = vector.load %arg7[%c0_150, %c0_151] : memref<1x128xf32, #tpu.memory_space<vmem>>, vector<1x128xf32>
    %169 = vector.broadcast %168 : vector<1x128xf32> to vector<2x128xf32>
    %170 = arith.mulf %167, %169 : vector<2x128xf32>
    %cst_152 = arith.constant dense<0.000000e+00> : vector<2xf32>
    %171 = vector.multi_reduction <add>, %170, %cst_152 [1] : vector<2x128xf32> to vector<2xf32>
    %172 = vector.shape_cast %171 : vector<2xf32> to vector<2x1xf32>
    %c0_153 = arith.constant 0 : index
    %c0_154 = arith.constant 0 : index
    %173 = vector.load %arg8[%c0_153, %c0_154] : memref<1x1xf32, #tpu.memory_space<vmem>>, vector<1x1xf32>
    %174 = vector.broadcast %173 : vector<1x1xf32> to vector<2x1xf32>
    %175 = arith.addf %172, %174 : vector<2x1xf32>
    %c0_155 = arith.constant 0 : index
    %c0_156 = arith.constant 0 : index
    %176 = vector.load %arg9[%c0_155, %c0_156] : memref<2x1xf32, #tpu.memory_space<vmem>>, vector<2x1xf32>
    tpu.vector_store %arg9[%c0_155, %c0_156], %175 {strides = array<i32>} : memref<2x1xf32, #tpu.memory_space<vmem>>, vector<2x1xf32>,
    return
  }
}

</mosaic_0001>

<bundles_post_ra>
// kernel: cnn_forward.1
= control target key start
LH: loop header
LB: loop body
LE: loop exit
PB: predicated region body
PF: predicated region fallthrough
CT: control target
= control target key end

     0   :  { %vm68_vm0 = vcmask 130048   ;;  %s2902_s24 = smov 64   ;;  %v278_v55 = vlaneseq  ;;  %vm407_vm4 = vcmask 523264   ;;  %vm617_vm6 = vcmask 261120   ;;  %s2905_s22 = smov [#allocation2]   ;;  %s3388_s1 = inlined_call_operand.vmem [shape: f32[16,128], index: 1, kind: input, shape index: {}]   ;;  %s3389_s0 = inlined_call_operand.vmem [shape: f32[122,16], index: 0, kind: input, shape index: {}]   ;;  %s3390_s2 = inlined_call_operand.vmem [shape: f32[1,128], index: 2, kind: input, shape index: {}]   ;;  %s3391_s3 = inlined_call_operand.vmem [shape: f32[64,64], index: 3, kind: input, shape index: {}]   ;;  %s3392_s4 = inlined_call_operand.vmem [shape: f32[1,64], index: 4, kind: input, shape index: {}]   ;;  %s3393_s5 = inlined_call_operand.hbm [shape: bf16[1952,128], index: 5, kind: input, shape index: {}]   ;;  %s3394_s6 = inlined_call_operand.vmem [shape: f32[1,128], index: 6, kind: input, shape index: {}]   ;;  %s3395_s7 = inlined_call_operand.vmem [shape: f32[1,128], index: 7, kind: input, shape index: {}]   ;;  %s3396_s9 = inlined_call_operand.vmem [shape: f32[2,1], index: 9, kind: output, shape index: {}]   ;;  %s3397_s8 = inlined_call_operand.<no memory space> [shape: f32[1,1], index: 8, kind: input, shape index: {}]  }
   0x1   :  { %v63_v0 = vld [vmem:[%s3388_s1 + $0x8] sm:$0xff]  ;;  %v62_v1 = vld [vmem:[%s3388_s1] sm:$0xff]  ;;  %v48_v4 = vld [vmem:[%s3389_s0 + $0x10] sm:$0xff]  ;;  %s2903_s1 = smov 96   ;;  %vm633_vm7 = vcmask 254976   ;;  %vm642_vm8 = vcmask 517376  }
   0x2   :  { %131 = vmatpush.msra.mxu0 %v63_v0  ;;  %v46_v2 = vld [vmem:[%s3389_s0] sm:$0xff]  ;;  %v47_v3 = vld [vmem:[%s3389_s0 + $0x8] sm:$0xff]  ;;  %v49_v5 = vld [vmem:[%s3389_s0 + $0x18] sm:$0xff]  ;;  %v279_v57 = vshrl.u32 %v278_v55, 7  ;;  %v3125_v58 = vand.u32 127, %v278_v55  ;;  %s40_s21 = sshll.u32 %s3393_s5, 4  ;;  %s41_s21 = int_to_ptr.hbm [resolvable:$true] %s40_s21 }
   0x3   :  { %v50_v6 = vld [vmem:[%s3389_s0 + $0x20] sm:$0xff]  ;;  %v51_v7 = vld [vmem:[%s3389_s0 + $0x28] sm:$0xff]  ;;  %v52_v8 = vld [vmem:[%s3389_s0 + $0x30] sm:$0xff]  ;;  %s42_s23 = sshll.u32 %s2905_s22, 4  ;;  %vm649_vm9 = vcmask 779776   ;;  %vm656_vm10 = vcmask 1042176   ;;  %s43_s23 = int_to_ptr.vmem [resolvable:$true] %s42_s23 }
   0x4   :  { %132 = vmatpush.msra.mxu0 %v62_v1  ;;  %v53_v9 = vld [vmem:[%s3389_s0 + $0x38] sm:$0xff]  ;;  %v54_v10 = vld [vmem:[%s3389_s0 + $0x40] sm:$0xff]  ;;  %v55_v11 = vld [vmem:[%s3389_s0 + $0x48] sm:$0xff]  ;;  %vm297_vm1 = vcmp.lt.s32.totalorder %v3125_v58, 16  ;;  %vm298_vm2 = vcmp.lt.s32.totalorder %v279_v57, 2  ;;  %vm330_vm5 = vcmp.ge.s32.totalorder %v3125_v58, 48 }
   0x5   :  { %2223 = vmatmul.msk.f32.vlgmr.msra.gmra.mxu0 %vm68_vm0, %v46_v2  ;;  %v56_v12 = vld [vmem:[%s3389_s0 + $0x50] sm:$0xff]  ;;  %v57_v13 = vld [vmem:[%s3389_s0 + $0x58] sm:$0xff]  ;;  %v58_v14 = vld [vmem:[%s3389_s0 + $0x60] sm:$0xff]  ;;  %45 = dma.hbm_to_vmem [thread:$0]  %s41_s21, 15616, %s43_s23, [#allocation3] }
   0x6   :  { %v59_v15 = vld [vmem:[%s3389_s0 + $0x68] sm:$0xff]  ;;  %v60_v16 = vld [vmem:[%s3389_s0 + $0x70] sm:$0xff]  ;;  %v61_v17 = vld [vmem:[%s3389_s0 + $0x78] sm:$0x3] }
   0x7   :  { %v3029_v18 = vld [vmem:[%s3390_s2] ss:$0 sm:$0xff]  ;;  %v402_v39 = vld [vmem:[%s3391_s3 + $0x38] sm:$0xff]  ;;  %v401_v40 = vld [vmem:[%s3391_s3 + $0x30] sm:$0xff] }
   0x8   :  { %464 = vmatpush.msra.mxu1 %v402_v39  ;;  %v400_v41 = vld [vmem:[%s3391_s3 + $0x28] sm:$0xff]  ;;  %v399_v44 = vld [vmem:[%s3391_s3 + $0x20] sm:$0xff]  ;;  %v398_v45 = vld [vmem:[%s3391_s3 + $0x18] sm:$0xff] }
   0x9   :  { %v397_v46 = vld [vmem:[%s3391_s3 + $0x10] sm:$0xff]  ;;  %v396_v47 = vld [vmem:[%s3391_s3 + $0x8] sm:$0xff]  ;;  %v395_v50 = vld [vmem:[%s3391_s3] sm:$0xff] }
   0xa   :  { %465 = vmatpush.msra.mxu1 %v401_v40  ;;  %vm314_vm3 = vmand %vm297_vm1, %vm298_vm2 }
   0xc   :  { %466 = vmatpush.msra.mxu1 %v400_v41 }
   0xd   :  { %2224 = vmatmul.msk.f32.gmra.mxu0 %vm68_vm0, %v47_v3 }
   0xe   :  { %467 = vmatpush.msra.mxu1 %v399_v44 }
  0x10   :  { %468 = vmatpush.msra.mxu1 %v398_v45 }
  0x12   :  { %469 = vmatpush.msra.mxu1 %v397_v46 }
  0x14   :  { %470 = vmatpush.msra.mxu1 %v396_v47 }
  0x15   :  { %2225 = vmatmul.msk.f32.gmra.mxu0 %vm68_vm0, %v48_v4 }
  0x16   :  { %471 = vmatpush.msra.mxu1 %v395_v50 }
  0x1d   :  { %2226 = vmatmul.msk.f32.gmra.mxu0 %vm68_vm0, %v49_v5 }
  0x25   :  { %2227 = vmatmul.msk.f32.gmra.mxu0 %vm68_vm0, %v50_v6 }
  0x2d   :  { %2228 = vmatmul.msk.f32.gmra.mxu0 %vm68_vm0, %v51_v7 }
  0x35   :  { %2229 = vmatmul.msk.f32.gmra.mxu0 %vm68_vm0, %v52_v8 }
  0x3d   :  { %2230 = vmatmul.msk.f32.gmra.mxu0 %vm68_vm0, %v53_v9 }
  0x45   :  { %2231 = vmatmul.msk.f32.gmra.mxu0 %vm68_vm0, %v54_v10 }
  0x4d   :  { %2232 = vmatmul.msk.f32.gmra.mxu0 %vm68_vm0, %v55_v11 }
  0x55   :  { %2233 = vmatmul.msk.f32.gmra.mxu0 %vm68_vm0, %v56_v12 }
  0x5d   :  { %2234 = vmatmul.msk.f32.gmra.mxu0 %vm68_vm0, %v57_v13 }
  0x65   :  { %2235 = vmatmul.msk.f32.gmra.mxu0 %vm68_vm0, %v58_v14 }
  0x6d   :  { %2236 = vmatmul.msk.f32.gmra.mxu0 %vm68_vm0, %v59_v15 }
  0x75   :  { %2237 = vmatmul.msk.f32.gmra.mxu0 %vm68_vm0, %v60_v16 }
  0x7d   :  { %2238 = vmatmul.msk.f32.gmra.mxu0 %vm68_vm0, %v61_v17 }
  0x82   :  { %v134_v19 = vpop.f32.mrf.mxu0 }
  0x83   :  { %v3032_v20 = vadd.f32 %v3029_v18, %v134_v19 }
  0x85   :  { %198 = vrot.lane.b32.xlu0 %v3032_v20, %s2902_s24 }
  0x8a   :  { %v137_v21 = vpop.f32.mrf.mxu0 }
  0x8b   :  { %v3037_v22 = vadd.f32 %v3029_v18, %v137_v21 }
  0x8d   :  { %200 = vrot.lane.b32.xlu0 %v3037_v22, %s2902_s24 }
  0x92   :  { %v140_v23 = vpop.f32.mrf.mxu0 }
  0x93   :  { %v3042_v24 = vadd.f32 %v3029_v18, %v140_v23 }
  0x95   :  { %202 = vrot.lane.b32.xlu1 %v3042_v24, %s2902_s24 }
  0x9a   :  { %v143_v25 = vpop.f32.mrf.mxu0 }
  0x9b   :  { %v3047_v26 = vadd.f32 %v3029_v18, %v143_v25 }
  0x9d   :  { %204 = vrot.lane.b32.xlu1 %v3047_v26, %s2902_s24 }
  0xa2   :  { %v146_v27 = vpop.f32.mrf.mxu0 }
  0xa3   :  { %v3052_v28 = vadd.f32 %v3029_v18, %v146_v27 }
  0xa5   :  { %206 = vrot.lane.b32.xlu2 %v3052_v28, %s2902_s24 }
  0xaa   :  { %v149_v29 = vpop.f32.mrf.mxu0 }
  0xab   :  { %v3057_v30 = vadd.f32 %v3029_v18, %v149_v29 }
  0xad   :  { %208 = vrot.lane.b32.xlu2 %v3057_v30, %s2902_s24 }
  0xb2   :  { %v152_v31 = vpop.f32.mrf.mxu0 }
  0xb3   :  { %v3062_v32 = vadd.f32 %v3029_v18, %v152_v31 }
  0xb5   :  { %210 = vrot.lane.b32.xlu0 %v3062_v32, %s2902_s24 }
  0xba   :  { %v155_v33 = vpop.f32.mrf.mxu0 }
  0xbb   :  { %v3067_v34 = vadd.f32 %v3029_v18, %v155_v33 }
  0xbd   :  { %212 = vrot.lane.b32.xlu1 %v3067_v34, %s2902_s24 }
  0xc2   :  { %v158_v35 = vpop.f32.mrf.mxu0 }
  0xc3   :  { %v3072_v36 = vadd.f32 %v3029_v18, %v158_v35 }
  0xc5   :  { %214 = vrot.lane.b32.xlu2 %v3072_v36, %s2902_s24 }
  0xca   :  { %v161_v37 = vpop.f32.mrf.mxu0 }
  0xcb   :  { %v3077_v38 = vadd.f32 %v3029_v18, %v161_v37 }
  0xcd   :  { %216 = vrot.lane.b32.xlu0 %v3077_v38, %s2902_s24 }
  0xd2   :  { %v164_v42 = vpop.f32.mrf.mxu0 }
  0xd3   :  { %v3091_v43 = vadd.f32 %v3029_v18, %v164_v42 }
  0xd5   :  { %218 = vrot.lane.b32.xlu1 %v3091_v43, %s2902_s24 }
  0xda   :  { %v167_v48 = vpop.f32.mrf.mxu0 }
  0xdb   :  { %v3108_v49 = vadd.f32 %v3029_v18, %v167_v48  ;;  %v2872_v48 = vld [vmem:[%s3392_s4] ss:$0 sm:$0xff]  ;;  %s2904_s4 = smov 32  }
  0xdd   :  { %220 = vrot.lane.b32.xlu2 %v3108_v49, %s2902_s24 }
  0xe2   :  { %v170_v51 = vpop.f32.mrf.mxu0 }
  0xe3   :  { %v3116_v52 = vadd.f32 %v3029_v18, %v170_v51 }
  0xe5   :  { %222 = vrot.lane.b32.xlu0 %v3116_v52, %s2902_s24 }
  0xea   :  { %v173_v53 = vpop.f32.mrf.mxu0 }
  0xeb   :  { %v3121_v54 = vadd.f32 %v3029_v18, %v173_v53 }
  0xed   :  { %224 = vrot.lane.b32.xlu1 %v3121_v54, %s2902_s24 }
  0xf2   :  { %v176_v56 = vpop.f32.mrf.mxu0 }
  0xf3   :  { %v3128_v59 = vadd.f32 %v3029_v18, %v176_v56 }
  0xf5   :  { %226 = vrot.lane.b32.xlu2 %v3128_v59, %s2902_s24 }
  0xf7   :  { %v199_v60 = vpop.permute.xlu0 %198 }
  0xf8   :  { %v246_v61 = vmax.f32 %v3032_v20, %v199_v60 }
  0xfa   :  { %v262_v62 = vmax.f32 %v246_v61, 0.0  ;;  %v179_v63 = vpop.f32.mrf.mxu0 }
  0xfb   :  { %v3135_v0 = vadd.f32 %v3029_v18, %v179_v63 }
  0xfc   :  { %v379_v1 = vsel %vm314_vm3, 0.0, %v262_v62 }
  0xfd   :  { %228 = vrot.lane.b32.xlu0 %v3135_v0, %s2902_s24  ;;  %2239 = vmatmul.msk.f32.vlgmr.msra.gmra.mxu1 %vm407_vm4, %v379_v1 }
  0xff   :  { %v201_v2 = vpop.permute.xlu0 %200  ;;  %v207_v10 = vpop.permute.xlu2 %206 }
 0x100   :  { %v247_v3 = vmax.f32 %v3037_v22, %v201_v2  ;;  %v250_v12 = vmax.f32 %v3052_v28, %v207_v10 }
 0x102   :  { %v263_v4 = vmax.f32 %v247_v3, 0.0  ;;  %v266_v13 = vmax.f32 %v250_v12, 0.0 }
 0x105   :  { %2240 = vmatmul.msk.f32.gmra.mxu1 %vm407_vm4, %v263_v4 }
 0x107   :  { %v203_v5 = vpop.permute.xlu1 %202  ;;  %v209_v14 = vpop.permute.xlu2 %208 }
 0x108   :  { %v248_v6 = vmax.f32 %v3042_v24, %v203_v5  ;;  %v251_v15 = vmax.f32 %v3057_v30, %v209_v14 }
 0x10a   :  { %v264_v7 = vmax.f32 %v248_v6, 0.0  ;;  %v267_v16 = vmax.f32 %v251_v15, 0.0 }
 0x10d   :  { %2241 = vmatmul.msk.f32.gmra.mxu1 %vm407_vm4, %v264_v7 }
 0x10f   :  { %v205_v8 = vpop.permute.xlu1 %204 }
 0x110   :  { %v249_v9 = vmax.f32 %v3047_v26, %v205_v8 }
 0x112   :  { %v265_v11 = vmax.f32 %v249_v9, 0.0 }
 0x115   :  { %2242 = vmatmul.msk.f32.gmra.mxu1 %vm407_vm4, %v265_v11 }
 0x11d   :  { %2243 = vmatmul.msk.f32.gmra.mxu1 %vm407_vm4, %v266_v13 }
 0x11f   :  { %v215_v23 = vpop.permute.xlu2 %214 }
 0x120   :  { %v254_v24 = vmax.f32 %v3072_v36, %v215_v23 }
 0x122   :  { %v270_v25 = vmax.f32 %v254_v24, 0.0 }
 0x125   :  { %2244 = vmatmul.msk.f32.gmra.mxu1 %vm407_vm4, %v267_v16 }
 0x127   :  { %v211_v17 = vpop.permute.xlu0 %210 }
 0x128   :  { %v252_v18 = vmax.f32 %v3062_v32, %v211_v17 }
 0x12a   :  { %v268_v19 = vmax.f32 %v252_v18, 0.0 }
 0x12d   :  { %2245 = vmatmul.msk.f32.gmra.mxu1 %vm407_vm4, %v268_v19 }
 0x12f   :  { %v213_v20 = vpop.permute.xlu1 %212 }
 0x130   :  { %v253_v21 = vmax.f32 %v3067_v34, %v213_v20 }
 0x132   :  { %v269_v22 = vmax.f32 %v253_v21, 0.0 }
 0x135   :  { %2246 = vmatmul.msk.f32.gmra.mxu1 %vm407_vm4, %v269_v22 }
 0x137   :  { %v221_v32 = vpop.permute.xlu2 %220 }
 0x138   :  { %v257_v33 = vmax.f32 %v3108_v49, %v221_v32 }
 0x13a   :  { %v273_v34 = vmax.f32 %v257_v33, 0.0 }
 0x13d   :  { %2247 = vmatmul.msk.f32.gmra.mxu1 %vm407_vm4, %v270_v25 }
 0x13f   :  { %v217_v26 = vpop.permute.xlu0 %216 }
 0x140   :  { %v255_v27 = vmax.f32 %v3077_v38, %v217_v26 }
 0x142   :  { %v271_v28 = vmax.f32 %v255_v27, 0.0 }
 0x145   :  { %2248 = vmatmul.msk.f32.gmra.mxu1 %vm407_vm4, %v271_v28 }
 0x147   :  { %v219_v29 = vpop.permute.xlu1 %218 }
 0x148   :  { %v256_v30 = vmax.f32 %v3091_v43, %v219_v29 }
 0x14a   :  { %v272_v31 = vmax.f32 %v256_v30, 0.0 }
 0x14d   :  { %2249 = vmatmul.msk.f32.gmra.mxu1 %vm407_vm4, %v272_v31 }
 0x14f   :  { %v227_v41 = vpop.permute.xlu2 %226 }
 0x150   :  { %v260_v42 = vmax.f32 %v3128_v59, %v227_v41 }
 0x152   :  { %v276_v43 = vmax.f32 %v260_v42, 0.0 }
 0x155   :  { %2250 = vmatmul.msk.f32.gmra.mxu1 %vm407_vm4, %v273_v34 }
 0x157   :  { %v223_v35 = vpop.permute.xlu0 %222 }
 0x158   :  { %v258_v36 = vmax.f32 %v3116_v52, %v223_v35 }
 0x15a   :  { %v274_v37 = vmax.f32 %v258_v36, 0.0 }
 0x15d   :  { %2251 = vmatmul.msk.f32.gmra.mxu1 %vm407_vm4, %v274_v37 }
 0x15f   :  { %v225_v38 = vpop.permute.xlu1 %224 }
 0x160   :  { %v259_v39 = vmax.f32 %v3121_v54, %v225_v38 }
 0x162   :  { %v275_v40 = vmax.f32 %v259_v39, 0.0 }
 0x165   :  { %2252 = vmatmul.msk.f32.gmra.mxu1 %vm407_vm4, %v275_v40 }
 0x16d   :  { %2253 = vmatmul.msk.f32.gmra.mxu1 %vm407_vm4, %v276_v43 }
 0x16f   :  { %v229_v44 = vpop.permute.xlu0 %228 }
 0x170   :  { %v261_v45 = vmax.f32 %v3135_v0, %v229_v44 }
 0x172   :  { %v277_v46 = vmax.f32 %v261_v45, 0.0 }
 0x174   :  { %v394_v47 = vsel %vm330_vm5, 0.0, %v277_v46 }
 0x175   :  { %2254 = vmatmul.msk.f32.gmra.mxu1 %vm407_vm4, %v394_v47 }
 0x17a   :  { %v473_v49 = vpop.f32.mrf.mxu1 }
 0x17b   :  { %v474_v50 = vadd.f32 %v2872_v48, %v473_v49 }
 0x17d   :  { %537 = vrot.lane.b32.xlu1 %v474_v50, %s2903_s1 }
 0x182   :  { %v476_v51 = vpop.f32.mrf.mxu1 }
 0x183   :  { %v477_v52 = vadd.f32 %v2872_v48, %v476_v51 }
 0x185   :  { %539 = vrot.lane.b32.xlu2 %v477_v52, %s2903_s1 }
 0x18a   :  { %v479_v53 = vpop.f32.mrf.mxu1 }
 0x18b   :  { %v3176_v54 = vadd.f32 %v2872_v48, %v479_v53 }
 0x18d   :  { %541 = vrot.lane.b32.xlu0 %v3176_v54, %s2903_s1 }
 0x192   :  { %v482_v55 = vpop.f32.mrf.mxu1 }
 0x193   :  { %v3180_v56 = vadd.f32 %v2872_v48, %v482_v55 }
 0x195   :  { %543 = vrot.lane.b32.xlu1 %v3180_v56, %s2903_s1 }
 0x19a   :  { %v485_v57 = vpop.f32.mrf.mxu1 }
 0x19b   :  { %v486_v58 = vadd.f32 %v2872_v48, %v485_v57 }
 0x19d   :  { %545 = vrot.lane.b32.xlu2 %v486_v58, %s2903_s1 }
 0x1a2   :  { %v488_v59 = vpop.f32.mrf.mxu1 }
 0x1a3   :  { %v3185_v60 = vadd.f32 %v2872_v48, %v488_v59 }
 0x1a5   :  { %547 = vrot.lane.b32.xlu0 %v3185_v60, %s2903_s1 }
 0x1aa   :  { %v491_v61 = vpop.f32.mrf.mxu1 }
 0x1ab   :  { %v3189_v62 = vadd.f32 %v2872_v48, %v491_v61 }
 0x1ad   :  { %549 = vrot.lane.b32.xlu1 %v3189_v62, %s2903_s1 }
 0x1b2   :  { %v494_v63 = vpop.f32.mrf.mxu1 }
 0x1b3   :  { %v3193_v0 = vadd.f32 %v2872_v48, %v494_v63 }
 0x1b5   :  { %551 = vrot.lane.b32.xlu2 %v3193_v0, %s2903_s1 }
 0x1ba   :  { %v497_v1 = vpop.f32.mrf.mxu1 }
 0x1bb   :  { %v3197_v2 = vadd.f32 %v2872_v48, %v497_v1 }
 0x1bd   :  { %553 = vrot.lane.b32.xlu0 %v3197_v2, %s2903_s1 }
 0x1c2   :  { %v500_v3 = vpop.f32.mrf.mxu1 }
 0x1c3   :  { %v3201_v4 = vadd.f32 %v2872_v48, %v500_v3 }
 0x1c5   :  { %555 = vrot.lane.b32.xlu1 %v3201_v4, %s2903_s1 }
 0x1ca   :  { %v503_v5 = vpop.f32.mrf.mxu1 }
 0x1cb   :  { %v3205_v6 = vadd.f32 %v2872_v48, %v503_v5 }
 0x1cd   :  { %557 = vrot.lane.b32.xlu2 %v3205_v6, %s2903_s1 }
 0x1d2   :  { %v506_v7 = vpop.f32.mrf.mxu1 }
 0x1d3   :  { %v3209_v8 = vadd.f32 %v2872_v48, %v506_v7 }
 0x1d5   :  { %559 = vrot.lane.b32.xlu0 %v3209_v8, %s2903_s1 }
 0x1da   :  { %v509_v9 = vpop.f32.mrf.mxu1 }
 0x1db   :  { %v3213_v10 = vadd.f32 %v2872_v48, %v509_v9 }
 0x1dd   :  { %561 = vrot.lane.b32.xlu1 %v3213_v10, %s2903_s1 }
 0x1df   :  { %v540_v11 = vpop.permute.xlu2 %539 }
 0x1e0   :  { %v586_v12 = vmax.f32 %v477_v52, %v540_v11 }
 0x1e2   :  { %v602_v13 = vmax.f32 %v586_v12, 0.0  ;;  %v512_v14 = vpop.f32.mrf.mxu1 }
 0x1e3   :  { %v3217_v15 = vadd.f32 %v2872_v48, %v512_v14 }
 0x1e4   :  { %619 = vst.msk [vmem:[#allocation4 + $0x8] sm:$0xff] %vm617_vm6, %v602_v13 }
 0x1e5   :  { %563 = vrot.lane.b32.xlu2 %v3217_v15, %s2903_s1 }
 0x1ea   :  { %v515_v16 = vpop.f32.mrf.mxu1 }
 0x1eb   :  { %v3222_v17 = vadd.f32 %v2872_v48, %v515_v16  ;;  %v658_v18 = vld [vmem:[#allocation4 + $0x8] sm:$0x3]  ;;  %v666_v34 = vld [vmem:[#allocation4 + $0xc] sm:$0x3]  ;;  %v660_v35 = vld [vmem:[#allocation4 + $0xa] sm:$0x3] }
 0x1ec   :  { %659 = vst.msk [vmem:[#allocation5 + $0x2] sm:$0x3] %vm633_vm7, %v658_v18  ;;  %v672_v36 = vld [vmem:[#allocation4 + $0xe] sm:$0x3] }
 0x1ed   :  { %565 = vrot.lane.b32.xlu0 %v3222_v17, %s2903_s1 }
 0x1ef   :  { %v538_v19 = vpop.permute.xlu1 %537 }
 0x1f0   :  { %v585_v20 = vmax.f32 %v474_v50, %v538_v19 }
 0x1f2   :  { %v601_v21 = vmax.f32 %v585_v20, 0.0  ;;  %v518_v22 = vpop.f32.mrf.mxu1 }
 0x1f3   :  { %v3227_v23 = vadd.f32 %v2872_v48, %v518_v22 }
 0x1f4   :  { %618 = vst.msk [vmem:[#allocation4] sm:$0xff] %vm617_vm6, %v601_v21 }
 0x1f5   :  { %567 = vrot.lane.b32.xlu1 %v3227_v23, %s2903_s1 }
 0x1f7   :  { %v546_v24 = vpop.permute.xlu2 %545 }
 0x1f8   :  { %v589_v25 = vmax.f32 %v486_v58, %v546_v24 }
 0x1fa   :  { %v605_v26 = vmax.f32 %v589_v25, 0.0 }
 0x1fb   :  { %v644_v27 = vld [vmem:[#allocation4 + $0x4] sm:$0x3]  ;;  %v637_v28 = vld [vmem:[#allocation4 + $0x2] sm:$0x3]  ;;  %v651_v29 = vld [vmem:[#allocation4 + $0x6] sm:$0x3] }
 0x1fc   :  { %622 = vst.msk [vmem:[#allocation4 + $0x20] sm:$0xff] %vm617_vm6, %v605_v26  ;;  %646 = vrot.lane.b32.xlu0 %v644_v27, %s2902_s24  ;;  %639 = vrot.lane.b32.xlu2 %v637_v28, %s2904_s4  ;;  %v635_v30 = vld [vmem:[#allocation4] sm:$0x3] }
 0x1fd   :  { %653 = vrot.lane.b32.xlu1 %v651_v29, %s2903_s1  ;;  %636 = vst.msk [vmem:[#allocation5] sm:$0x3] %vm633_vm7, %v635_v30 }
 0x1ff   :  { %v542_v31 = vpop.permute.xlu0 %541 }
 0x200   :  { %v587_v32 = vmax.f32 %v3176_v54, %v542_v31 }
 0x202   :  { %v603_v33 = vmax.f32 %v587_v32, 0.0 }
 0x203   :  { %v718_v37 = vld [vmem:[#allocation4 + $0x20] sm:$0x3]  ;;  %v726_v55 = vld [vmem:[#allocation4 + $0x24] sm:$0x3]  ;;  %v732_v57 = vld [vmem:[#allocation4 + $0x26] sm:$0x3] }
 0x204   :  { %620 = vst.msk [vmem:[#allocation4 + $0x10] sm:$0xff] %vm617_vm6, %v603_v33  ;;  %668 = vrot.lane.b32.xlu0 %v666_v34, %s2902_s24  ;;  %662 = vrot.lane.b32.xlu2 %v660_v35, %s2904_s4 }
 0x205   :  { %674 = vrot.lane.b32.xlu1 %v672_v36, %s2903_s1  ;;  %719 = vst.msk [vmem:[#allocation5 + $0x8] sm:$0x3] %vm633_vm7, %v718_v37 }
 0x207   :  { %v544_v38 = vpop.permute.xlu1 %543 }
 0x208   :  { %v588_v39 = vmax.f32 %v3180_v56, %v544_v38  ;;  %v720_v56 = vld [vmem:[#allocation4 + $0x22] sm:$0x3] }
 0x20a   :  { %v604_v40 = vmax.f32 %v588_v39, 0.0 }
 0x20b   :  { %v686_v41 = vld [vmem:[#allocation4 + $0x14] sm:$0x3]  ;;  %v680_v42 = vld [vmem:[#allocation4 + $0x12] sm:$0x3]  ;;  %v692_v43 = vld [vmem:[#allocation4 + $0x16] sm:$0x3] }
 0x20c   :  { %621 = vst.msk [vmem:[#allocation4 + $0x18] sm:$0xff] %vm617_vm6, %v604_v40  ;;  %688 = vrot.lane.b32.xlu0 %v686_v41, %s2902_s24  ;;  %682 = vrot.lane.b32.xlu2 %v680_v42, %s2904_s4  ;;  %v678_v44 = vld [vmem:[#allocation4 + $0x10] sm:$0x3] }
 0x20d   :  { %694 = vrot.lane.b32.xlu1 %v692_v43, %s2903_s1  ;;  %679 = vst.msk [vmem:[#allocation5 + $0x4] sm:$0x3] %vm633_vm7, %v678_v44 }
 0x20f   :  { %v552_v45 = vpop.permute.xlu2 %551 }
 0x210   :  { %v592_v46 = vmax.f32 %v3193_v0, %v552_v45 }
 0x212   :  { %v608_v47 = vmax.f32 %v592_v46, 0.0 }
 0x213   :  { %v706_v48 = vld [vmem:[#allocation4 + $0x1c] sm:$0x3]  ;;  %v700_v49 = vld [vmem:[#allocation4 + $0x1a] sm:$0x3]  ;;  %v712_v50 = vld [vmem:[#allocation4 + $0x1e] sm:$0x3] }
 0x214   :  { %625 = vst.msk [vmem:[#allocation4 + $0x38] sm:$0xff] %vm617_vm6, %v608_v47  ;;  %708 = vrot.lane.b32.xlu0 %v706_v48, %s2902_s24  ;;  %702 = vrot.lane.b32.xlu2 %v700_v49, %s2904_s4  ;;  %v698_v51 = vld [vmem:[#allocation4 + $0x18] sm:$0x3] }
 0x215   :  { %714 = vrot.lane.b32.xlu1 %v712_v50, %s2903_s1  ;;  %699 = vst.msk [vmem:[#allocation5 + $0x6] sm:$0x3] %vm633_vm7, %v698_v51 }
 0x217   :  { %v548_v52 = vpop.permute.xlu0 %547 }
 0x218   :  { %v590_v53 = vmax.f32 %v3185_v60, %v548_v52 }
 0x21a   :  { %v606_v54 = vmax.f32 %v590_v53, 0.0 }
 0x21b   :  { %v778_v58 = vld [vmem:[#allocation4 + $0x38] sm:$0x3]  ;;  %v780_v19 = vld [vmem:[#allocation4 + $0x3a] sm:$0x3]  ;;  %v792_v20 = vld [vmem:[#allocation4 + $0x3e] sm:$0x3] }
 0x21c   :  { %623 = vst.msk [vmem:[#allocation4 + $0x28] sm:$0xff] %vm617_vm6, %v606_v54  ;;  %728 = vrot.lane.b32.xlu0 %v726_v55, %s2902_s24  ;;  %722 = vrot.lane.b32.xlu2 %v720_v56, %s2904_s4 }
 0x21d   :  { %734 = vrot.lane.b32.xlu1 %v732_v57, %s2903_s1  ;;  %779 = vst.msk [vmem:[#allocation5 + $0xe] sm:$0x3] %vm633_vm7, %v778_v58 }
 0x21f   :  { %v550_v59 = vpop.permute.xlu1 %549 }
 0x220   :  { %v591_v61 = vmax.f32 %v3189_v62, %v550_v59 }
 0x222   :  { %v607_v63 = vmax.f32 %v591_v61, 0.0 }
 0x223   :  { %v746_v60 = vld [vmem:[#allocation4 + $0x2c] sm:$0x3]  ;;  %v740_v0 = vld [vmem:[#allocation4 + $0x2a] sm:$0x3]  ;;  %v752_v1 = vld [vmem:[#allocation4 + $0x2e] sm:$0x3] }
 0x224   :  { %624 = vst.msk [vmem:[#allocation4 + $0x30] sm:$0xff] %vm617_vm6, %v607_v63  ;;  %748 = vrot.lane.b32.xlu0 %v746_v60, %s2902_s24  ;;  %742 = vrot.lane.b32.xlu2 %v740_v0, %s2904_s4  ;;  %v738_v3 = vld [vmem:[#allocation4 + $0x28] sm:$0x3] }
 0x225   :  { %754 = vrot.lane.b32.xlu1 %v752_v1, %s2903_s1  ;;  %739 = vst.msk [vmem:[#allocation5 + $0xa] sm:$0x3] %vm633_vm7, %v738_v3 }
 0x227   :  { %v558_v5 = vpop.permute.xlu2 %557 }
 0x228   :  { %v595_v7 = vmax.f32 %v3205_v6, %v558_v5  ;;  %v786_v6 = vld [vmem:[#allocation4 + $0x3c] sm:$0x3] }
 0x22a   :  { %v611_v9 = vmax.f32 %v595_v7, 0.0 }
 0x22b   :  { %v766_v62 = vld [vmem:[#allocation4 + $0x34] sm:$0x3]  ;;  %v760_v11 = vld [vmem:[#allocation4 + $0x32] sm:$0x3]  ;;  %v772_v12 = vld [vmem:[#allocation4 + $0x36] sm:$0x3] }
 0x22c   :  { %628 = vst.msk [vmem:[#allocation4 + $0x50] sm:$0xff] %vm617_vm6, %v611_v9  ;;  %768 = vrot.lane.b32.xlu0 %v766_v62, %s2902_s24  ;;  %762 = vrot.lane.b32.xlu2 %v760_v11, %s2904_s4  ;;  %v758_v13 = vld [vmem:[#allocation4 + $0x30] sm:$0x3] }
 0x22d   :  { %774 = vrot.lane.b32.xlu1 %v772_v12, %s2903_s1  ;;  %759 = vst.msk [vmem:[#allocation5 + $0xc] sm:$0x3] %vm633_vm7, %v758_v13 }
 0x22f   :  { %v554_v14 = vpop.permute.xlu0 %553 }
 0x230   :  { %v593_v16 = vmax.f32 %v3197_v2, %v554_v14 }
 0x232   :  { %v609_v18 = vmax.f32 %v593_v16, 0.0 }
 0x233   :  { %v838_v21 = vld [vmem:[#allocation4 + $0x50] sm:$0x3]  ;;  %v840_v38 = vld [vmem:[#allocation4 + $0x52] sm:$0x3]  ;;  %v852_v43 = vld [vmem:[#allocation4 + $0x56] sm:$0x3] }
 0x234   :  { %626 = vst.msk [vmem:[#allocation4 + $0x40] sm:$0xff] %vm617_vm6, %v609_v18  ;;  %788 = vrot.lane.b32.xlu0 %v786_v6, %s2902_s24  ;;  %782 = vrot.lane.b32.xlu2 %v780_v19, %s2904_s4 }
 0x235   :  { %794 = vrot.lane.b32.xlu1 %v792_v20, %s2903_s1  ;;  %839 = vst.msk [vmem:[#allocation5 + $0x14] sm:$0x3] %vm633_vm7, %v838_v21 }
 0x237   :  { %v556_v22 = vpop.permute.xlu1 %555 }
 0x238   :  { %v594_v24 = vmax.f32 %v3201_v4, %v556_v22 }
 0x23a   :  { %v610_v25 = vmax.f32 %v594_v24, 0.0 }
 0x23b   :  { %v806_v2 = vld [vmem:[#allocation4 + $0x44] sm:$0x3]  ;;  %v800_v26 = vld [vmem:[#allocation4 + $0x42] sm:$0x3]  ;;  %v812_v27 = vld [vmem:[#allocation4 + $0x46] sm:$0x3] }
 0x23c   :  { %627 = vst.msk [vmem:[#allocation4 + $0x48] sm:$0xff] %vm617_vm6, %v610_v25  ;;  %808 = vrot.lane.b32.xlu0 %v806_v2, %s2902_s24  ;;  %802 = vrot.lane.b32.xlu2 %v800_v26, %s2904_s4  ;;  %v798_v28 = vld [vmem:[#allocation4 + $0x40] sm:$0x3] }
 0x23d   :  { %814 = vrot.lane.b32.xlu1 %v812_v27, %s2903_s1  ;;  %799 = vst.msk [vmem:[#allocation5 + $0x10] sm:$0x3] %vm633_vm7, %v798_v28 }
 0x23f   :  { %v564_v29 = vpop.permute.xlu2 %563 }
 0x240   :  { %v598_v30 = vmax.f32 %v3217_v15, %v564_v29  ;;  %v846_v15 = vld [vmem:[#allocation4 + $0x54] sm:$0x3] }
 0x242   :  { %v614_v31 = vmax.f32 %v598_v30, 0.0 }
 0x243   :  { %v826_v4 = vld [vmem:[#allocation4 + $0x4c] sm:$0x3]  ;;  %v820_v32 = vld [vmem:[#allocation4 + $0x4a] sm:$0x3]  ;;  %v832_v33 = vld [vmem:[#allocation4 + $0x4e] sm:$0x3] }
 0x244   :  { %631 = vst.msk [vmem:[#allocation4 + $0x68] sm:$0xff] %vm617_vm6, %v614_v31  ;;  %828 = vrot.lane.b32.xlu0 %v826_v4, %s2902_s24  ;;  %822 = vrot.lane.b32.xlu2 %v820_v32, %s2904_s4  ;;  %v818_v34 = vld [vmem:[#allocation4 + $0x48] sm:$0x3] }
 0x245   :  { %834 = vrot.lane.b32.xlu1 %v832_v33, %s2903_s1  ;;  %819 = vst.msk [vmem:[#allocation5 + $0x12] sm:$0x3] %vm633_vm7, %v818_v34 }
 0x247   :  { %v560_v35 = vpop.permute.xlu0 %559 }
 0x248   :  { %v596_v36 = vmax.f32 %v3209_v8, %v560_v35 }
 0x24a   :  { %v612_v37 = vmax.f32 %v596_v36, 0.0 }
 0x24b   :  { %v898_v39 = vld [vmem:[#allocation4 + $0x68] sm:$0x3]  ;;  %v900_v54 = vld [vmem:[#allocation4 + $0x6a] sm:$0x3]  ;;  %v906_v55 = vld [vmem:[#allocation4 + $0x6c] sm:$0x3] }
 0x24c   :  { %629 = vst.msk [vmem:[#allocation4 + $0x58] sm:$0xff] %vm617_vm6, %v612_v37  ;;  %848 = vrot.lane.b32.xlu0 %v846_v15, %s2902_s24  ;;  %842 = vrot.lane.b32.xlu2 %v840_v38, %s2904_s4  ;;  %v912_v59 = vld [vmem:[#allocation4 + $0x6e] sm:$0x3] }
 0x24d   :  { %899 = vst.msk [vmem:[#allocation5 + $0x1a] sm:$0x3] %vm633_vm7, %v898_v39  ;;  %v14_v39 = vstv %s3397_s8 }
 0x24e   :  { %15 = vst [vmem:[#allocation6] sm:$0x1] %v14_v39 }
 0x24f   :  { %v562_v40 = vpop.permute.xlu1 %561 }
 0x250   :  { %v597_v41 = vmax.f32 %v3213_v10, %v562_v40 }
 0x252   :  { %v613_v42 = vmax.f32 %v597_v41, 0.0 }
 0x253   :  { %v866_v44 = vld [vmem:[#allocation4 + $0x5c] sm:$0x3]  ;;  %v860_v45 = vld [vmem:[#allocation4 + $0x5a] sm:$0x3]  ;;  %v858_v8 = vld [vmem:[#allocation4 + $0x58] sm:$0x3] }
 0x254   :  { %630 = vst.msk [vmem:[#allocation4 + $0x60] sm:$0xff] %vm617_vm6, %v613_v42  ;;  %854 = vrot.lane.b32.xlu0 %v852_v43, %s2903_s1  ;;  %868 = vrot.lane.b32.xlu2 %v866_v44, %s2902_s24  ;;  %v872_v48 = vld [vmem:[#allocation4 + $0x5e] sm:$0x3] }
 0x255   :  { %862 = vrot.lane.b32.xlu1 %v860_v45, %s2904_s4  ;;  %859 = vst.msk [vmem:[#allocation5 + $0x16] sm:$0x3] %vm633_vm7, %v858_v8 }
 0x256   :  { %v640_v46 = vpop.permute.xlu2 %639 }
 0x257   :  { %643 = vst.msk [vmem:[#allocation5] sm:$0x3] %vm642_vm8, %v640_v46 }
 0x25b   :  { %v886_v10 = vld [vmem:[#allocation4 + $0x64] sm:$0x3]  ;;  %v880_v47 = vld [vmem:[#allocation4 + $0x62] sm:$0x3]  ;;  %v878_v49 = vld [vmem:[#allocation4 + $0x60] sm:$0x3] }
 0x25c   :  { %888 = vrot.lane.b32.xlu0 %v886_v10, %s2902_s24  ;;  %882 = vrot.lane.b32.xlu2 %v880_v47, %s2904_s4  ;;  %879 = vst.msk [vmem:[#allocation5 + $0x18] sm:$0x3] %vm633_vm7, %v878_v49  ;;  %v892_v5 = vld [vmem:[#allocation4 + $0x66] sm:$0x3] }
 0x25d   :  { %874 = vrot.lane.b32.xlu1 %v872_v48, %s2903_s1 }
 0x25e   :  { %v663_v50 = vpop.permute.xlu2 %662 }
 0x25f   :  { %665 = vst.msk [vmem:[#allocation5 + $0x2] sm:$0x3] %vm642_vm8, %v663_v50  ;;  %v566_v51 = vpop.permute.xlu0 %565 }
 0x260   :  { %v599_v52 = vmax.f32 %v3222_v17, %v566_v51 }
 0x262   :  { %v615_v53 = vmax.f32 %v599_v52, 0.0 }
 0x264   :  { %632 = vst.msk [vmem:[#allocation4 + $0x70] sm:$0xff] %vm617_vm6, %v615_v53  ;;  %902 = vrot.lane.b32.xlu0 %v900_v54, %s2904_s4 }
 0x265   :  { %908 = vrot.lane.b32.xlu1 %v906_v55, %s2902_s24 }
 0x266   :  { %v683_v56 = vpop.permute.xlu2 %682 }
 0x267   :  { %685 = vst.msk [vmem:[#allocation5 + $0x4] sm:$0x3] %vm642_vm8, %v683_v56  ;;  %v568_v57 = vpop.permute.xlu1 %567 }
 0x268   :  { %v600_v17 = vmax.f32 %v3227_v23, %v568_v57 }
 0x26a   :  { %v616_v58 = vmax.f32 %v600_v17, 0.0 }
 0x26b   :  { %v926_v61 = vld [vmem:[#allocation4 + $0x74] sm:$0x3]  ;;  %v920_v63 = vld [vmem:[#allocation4 + $0x72] sm:$0x3]  ;;  %v918_v60 = vld [vmem:[#allocation4 + $0x70] sm:$0x3] }
 0x26c   :  { %634 = vst.msk [vmem:[#allocation4 + $0x78] sm:$0x3] %vm633_vm7, %v616_v58  ;;  %914 = vrot.lane.b32.xlu0 %v912_v59, %s2903_s1  ;;  %928 = vrot.lane.b32.xlu2 %v926_v61, %s2902_s24  ;;  %v932_v7 = vld [vmem:[#allocation4 + $0x76] sm:$0x3] }
 0x26d   :  { %922 = vrot.lane.b32.xlu1 %v920_v63, %s2904_s4  ;;  %919 = vst.msk [vmem:[#allocation5 + $0x1c] sm:$0x3] %vm633_vm7, %v918_v60 }
 0x26e   :  { %v703_v0 = vpop.permute.xlu2 %702  ;;  %v647_v1 = vpop.permute.xlu0 %646 }
 0x26f   :  { %705 = vst.msk [vmem:[#allocation5 + $0x6] sm:$0x3] %vm642_vm8, %v703_v0  ;;  %v654_v23 = vpop.permute.xlu1 %653 }
 0x270   :  { %650 = vst.msk [vmem:[#allocation5] sm:$0x3] %vm649_vm9, %v647_v1 }
 0x271   :  { %657 = vst.msk [vmem:[#allocation5] sm:$0x3] %vm656_vm10, %v654_v23 }
 0x273   :  { %v938_v3 = vld [vmem:[#allocation4 + $0x78] sm:$0x3] }
 0x274   :  { %939 = vst.msk [vmem:[#allocation5 + $0x1e] sm:$0x3] %vm633_vm7, %v938_v3  ;;  %894 = vrot.lane.b32.xlu2 %v892_v5, %s2903_s1 }
 0x275   :  { %934 = vrot.lane.b32.xlu1 %v932_v7, %s2903_s1 }
 0x276   :  { %v723_v9 = vpop.permute.xlu2 %722  ;;  %v669_v62 = vpop.permute.xlu0 %668 }
 0x277   :  { %725 = vst.msk [vmem:[#allocation5 + $0x8] sm:$0x3] %vm642_vm8, %v723_v9  ;;  %v675_v11 = vpop.permute.xlu1 %674 }
 0x278   :  { %671 = vst.msk [vmem:[#allocation5 + $0x2] sm:$0x3] %vm649_vm9, %v669_v62 }
 0x279   :  { %677 = vst.msk [vmem:[#allocation5 + $0x2] sm:$0x3] %vm656_vm10, %v675_v11 }
 0x27e   :  { %v743_v12 = vpop.permute.xlu2 %742  ;;  %v689_v13 = vpop.permute.xlu0 %688 }
 0x27f   :  { %745 = vst.msk [vmem:[#allocation5 + $0xa] sm:$0x3] %vm642_vm8, %v743_v12  ;;  %v695_v14 = vpop.permute.xlu1 %694 }
 0x280   :  { %691 = vst.msk [vmem:[#allocation5 + $0x4] sm:$0x3] %vm649_vm9, %v689_v13 }
 0x281   :  { %697 = vst.msk [vmem:[#allocation5 + $0x4] sm:$0x3] %vm656_vm10, %v695_v14 }
 0x286   :  { %v763_v16 = vpop.permute.xlu2 %762  ;;  %v709_v18 = vpop.permute.xlu0 %708 }
 0x287   :  { %765 = vst.msk [vmem:[#allocation5 + $0xc] sm:$0x3] %vm642_vm8, %v763_v16  ;;  %v715_v6 = vpop.permute.xlu1 %714 }
 0x288   :  { %711 = vst.msk [vmem:[#allocation5 + $0x6] sm:$0x3] %vm649_vm9, %v709_v18 }
 0x289   :  { %717 = vst.msk [vmem:[#allocation5 + $0x6] sm:$0x3] %vm656_vm10, %v715_v6 }
 0x28e   :  { %v783_v19 = vpop.permute.xlu2 %782  ;;  %v729_v20 = vpop.permute.xlu0 %728 }
 0x28f   :  { %785 = vst.msk [vmem:[#allocation5 + $0xe] sm:$0x3] %vm642_vm8, %v783_v19  ;;  %v735_v21 = vpop.permute.xlu1 %734 }
 0x290   :  { %731 = vst.msk [vmem:[#allocation5 + $0x8] sm:$0x3] %vm649_vm9, %v729_v20 }
 0x291   :  { %737 = vst.msk [vmem:[#allocation5 + $0x8] sm:$0x3] %vm656_vm10, %v735_v21 }
 0x296   :  { %v803_v22 = vpop.permute.xlu2 %802  ;;  %v749_v24 = vpop.permute.xlu0 %748 }
 0x297   :  { %805 = vst.msk [vmem:[#allocation5 + $0x10] sm:$0x3] %vm642_vm8, %v803_v22  ;;  %v755_v25 = vpop.permute.xlu1 %754 }
 0x298   :  { %751 = vst.msk [vmem:[#allocation5 + $0xa] sm:$0x3] %vm649_vm9, %v749_v24 }
 0x299   :  { %757 = vst.msk [vmem:[#allocation5 + $0xa] sm:$0x3] %vm656_vm10, %v755_v25 }
 0x29e   :  { %v823_v2 = vpop.permute.xlu2 %822  ;;  %v769_v26 = vpop.permute.xlu0 %768 }
 0x29f   :  { %825 = vst.msk [vmem:[#allocation5 + $0x12] sm:$0x3] %vm642_vm8, %v823_v2  ;;  %v775_v27 = vpop.permute.xlu1 %774 }
 0x2a0   :  { %771 = vst.msk [vmem:[#allocation5 + $0xc] sm:$0x3] %vm649_vm9, %v769_v26 }
 0x2a1   :  { %777 = vst.msk [vmem:[#allocation5 + $0xc] sm:$0x3] %vm656_vm10, %v775_v27 }
 0x2a6   :  { %v843_v28 = vpop.permute.xlu2 %842  ;;  %v789_v29 = vpop.permute.xlu0 %788 }
 0x2a7   :  { %845 = vst.msk [vmem:[#allocation5 + $0x14] sm:$0x3] %vm642_vm8, %v843_v28  ;;  %v795_v30 = vpop.permute.xlu1 %794 }
 0x2a8   :  { %791 = vst.msk [vmem:[#allocation5 + $0xe] sm:$0x3] %vm649_vm9, %v789_v29 }
 0x2a9   :  { %797 = vst.msk [vmem:[#allocation5 + $0xe] sm:$0x3] %vm656_vm10, %v795_v30 }
 0x2ae   :  { %v869_v31 = vpop.permute.xlu2 %868  ;;  %v809_v4 = vpop.permute.xlu0 %808 }
 0x2af   :  { %811 = vst.msk [vmem:[#allocation5 + $0x10] sm:$0x3] %vm649_vm9, %v809_v4  ;;  %v815_v32 = vpop.permute.xlu1 %814 }
 0x2b0   :  { %817 = vst.msk [vmem:[#allocation5 + $0x10] sm:$0x3] %vm656_vm10, %v815_v32 }
 0x2b6   :  { %v883_v33 = vpop.permute.xlu2 %882  ;;  %v829_v34 = vpop.permute.xlu0 %828 }
 0x2b7   :  { %885 = vst.msk [vmem:[#allocation5 + $0x18] sm:$0x3] %vm642_vm8, %v883_v33  ;;  %v835_v35 = vpop.permute.xlu1 %834 }
 0x2b8   :  { %831 = vst.msk [vmem:[#allocation5 + $0x12] sm:$0x3] %vm649_vm9, %v829_v34 }
 0x2b9   :  { %837 = vst.msk [vmem:[#allocation5 + $0x12] sm:$0x3] %vm656_vm10, %v835_v35 }
 0x2be   :  { %v849_v36 = vpop.permute.xlu0 %848 }
 0x2bf   :  { %851 = vst.msk [vmem:[#allocation5 + $0x14] sm:$0x3] %vm649_vm9, %v849_v36 }
 0x2c6   :  { %v929_v37 = vpop.permute.xlu2 %928  ;;  %v855_v15 = vpop.permute.xlu0 %854 }
 0x2c7   :  { %v863_v38 = vpop.permute.xlu1 %862  ;;  %857 = vst.msk [vmem:[#allocation5 + $0x14] sm:$0x3] %vm656_vm10, %v855_v15 }
 0x2c8   :  { %865 = vst.msk [vmem:[#allocation5 + $0x16] sm:$0x3] %vm642_vm8, %v863_v38 }
 0x2c9   :  { %871 = vst.msk [vmem:[#allocation5 + $0x16] sm:$0x3] %vm649_vm9, %v869_v31 }
 0x2ce   :  { %v895_v40 = vpop.permute.xlu2 %894  ;;  %v889_v41 = vpop.permute.xlu0 %888 }
 0x2cf   :  { %v875_v42 = vpop.permute.xlu1 %874  ;;  %891 = vst.msk [vmem:[#allocation5 + $0x18] sm:$0x3] %vm649_vm9, %v889_v41 }
 0x2d0   :  { %877 = vst.msk [vmem:[#allocation5 + $0x16] sm:$0x3] %vm656_vm10, %v875_v42 }
 0x2d1   :  { %897 = vst.msk [vmem:[#allocation5 + $0x18] sm:$0x3] %vm656_vm10, %v895_v40 }
 0x2d6   :  { %v903_v43 = vpop.permute.xlu0 %902 }
 0x2d7   :  { %v909_v44 = vpop.permute.xlu1 %908  ;;  %905 = vst.msk [vmem:[#allocation5 + $0x1a] sm:$0x3] %vm642_vm8, %v903_v43 }
 0x2d8   :  { %911 = vst.msk [vmem:[#allocation5 + $0x1a] sm:$0x3] %vm649_vm9, %v909_v44 }
 0x2de   :  { %v915_v45 = vpop.permute.xlu0 %914 }
 0x2df   :  { %v923_v8 = vpop.permute.xlu1 %922  ;;  %917 = vst.msk [vmem:[#allocation5 + $0x1a] sm:$0x3] %vm656_vm10, %v915_v45 }
 0x2e0   :  { %925 = vst.msk [vmem:[#allocation5 + $0x1c] sm:$0x3] %vm642_vm8, %v923_v8 }
 0x2e1   :  { %931 = vst.msk [vmem:[#allocation5 + $0x1c] sm:$0x3] %vm649_vm9, %v929_v37 }
 0x2e7   :  { %v935_v46 = vpop.permute.xlu1 %934 }
 0x2e8   :  { %937 = vst.msk [vmem:[#allocation5 + $0x1c] sm:$0x3] %vm656_vm10, %v935_v46 }
 0x2e9   :  { %2900 = dma.done.wait [#allocation3], 15616 }
 0x2ea   :  { %2901 = vsyncadd [#allocation3], 4294951680  ;;  %v2752_v10 = vld [vmem:[#allocation2 + $0x38] sm:$0xff]  ;;  %v2751_v48 = vld [vmem:[#allocation2 + $0x30] sm:$0xff]  ;;  %vm2202_vm11 = vcmask 1041408   ;;  %vm2211_vm12 = vcmask 1024  }
 0x2eb   :  { %v2760_v47 = vld [vmem:[#allocation2 + $0x78] sm:$0xff]  ;;  %1988 = vmatpush.bf16.msra.mxu2 %v2752_v10  ;;  %v2759_v49 = vld [vmem:[#allocation2 + $0x70] sm:$0xff]  ;;  %v2750_v50 = vld [vmem:[#allocation2 + $0x28] sm:$0xff] }
 0x2ec   :  { %2001 = vmatpush.bf16.msra.mxu3 %v2760_v47  ;;  %v2758_v51 = vld [vmem:[#allocation2 + $0x68] sm:$0xff]  ;;  %v944_v52 = vld [vmem:[#allocation5] sm:$0xff]  ;;  %v2749_v53 = vld [vmem:[#allocation2 + $0x20] sm:$0xff] }
 0x2ed   :  { %952 = vst [vmem:[#allocation1] ss:$4 sm:$0xff] %v944_v52  ;;  %v2757_v54 = vld [vmem:[#allocation2 + $0x60] sm:$0xff]  ;;  %v2748_v55 = vld [vmem:[#allocation2 + $0x18] sm:$0xff]  ;;  %v2747_v57 = vld [vmem:[#allocation2 + $0x10] sm:$0xff] }
 0x2ee   :  { %v2756_v56 = vld [vmem:[#allocation2 + $0x58] sm:$0xff]  ;;  %v2755_v17 = vld [vmem:[#allocation2 + $0x50] sm:$0xff]  ;;  %v2746_v58 = vld [vmem:[#allocation2 + $0x8] sm:$0xff] }
 0x2ef   :  { %1989 = vmatpush.bf16.msra.mxu2 %v2751_v48  ;;  %v2754_v59 = vld [vmem:[#allocation2 + $0x48] sm:$0xff]  ;;  %v2745_v61 = vld [vmem:[#allocation2] sm:$0xff]  ;;  %v2768_v1 = vld [vmem:[#allocation2 + $0xb8] sm:$0xff] }
 0x2f0   :  { %2002 = vmatpush.bf16.msra.mxu3 %v2759_v49  ;;  %v2753_v63 = vld [vmem:[#allocation2 + $0x40] sm:$0xff]  ;;  %v2776_v23 = vld [vmem:[#allocation2 + $0xf8] sm:$0xff]  ;;  %v2767_v7 = vld [vmem:[#allocation2 + $0xb0] sm:$0xff] }
 0x2f1   :  { %v2775_v9 = vld [vmem:[#allocation2 + $0xf0] sm:$0xff]  ;;  %v946_v11 = vld [vmem:[#allocation5 + $0x10] sm:$0xff]  ;;  %v2766_v13 = vld [vmem:[#allocation2 + $0xa8] sm:$0xff] }
 0x2f2   :  { %v2774_v14 = vld [vmem:[#allocation2 + $0xe8] sm:$0xff]  ;;  %v2765_v16 = vld [vmem:[#allocation2 + $0xa0] sm:$0xff]  ;;  %v2764_v6 = vld [vmem:[#allocation2 + $0x98] sm:$0xff] }
 0x2f3   :  { %1990 = vmatpush.bf16.msra.mxu2 %v2750_v50  ;;  %v2773_v18 = vld [vmem:[#allocation2 + $0xe0] sm:$0xff]  ;;  %v2772_v19 = vld [vmem:[#allocation2 + $0xd8] sm:$0xff]  ;;  %v2763_v20 = vld [vmem:[#allocation2 + $0x90] sm:$0xff] }
 0x2f4   :  { %2003 = vmatpush.bf16.msra.mxu3 %v2758_v51  ;;  %v955_v60 = vld.sshfl [vmem:[#allocation1] sm:$0xff pattern:$0x73625140]  ;;  %v956_v0 = vld.sshfl [vmem:[#allocation1 + $0x8] sm:$0xff pattern:$0x73625140] }
 0x2f5   :  { %v989_v3 = vpack.c.bf16 %v955_v60, %v955_v60  ;;  %v990_v5 = vpack.c.bf16 %v956_v0, %v956_v0  ;;  %v957_v62 = vld.sshfl [vmem:[#allocation1 + $0x10] sm:$0xff pattern:$0x73625140]  ;;  %v958_v12 = vld.sshfl [vmem:[#allocation1 + $0x18] sm:$0xff pattern:$0x73625140] }
 0x2f6   :  { %963 = vst [vmem:[#allocation1] ss:$4 sm:$0xff] %v946_v11  ;;  %v2771_v21 = vld [vmem:[#allocation2 + $0xd0] sm:$0xff]  ;;  %v945_v22 = vld [vmem:[#allocation5 + $0x8] sm:$0xff]  ;;  %v2762_v24 = vld [vmem:[#allocation2 + $0x88] sm:$0xff]  ;;  %v991_v29 = vpack.c.bf16 %v957_v62, %v957_v62  ;;  %v992_v30 = vpack.c.bf16 %v958_v12, %v958_v12 }
 0x2f7   :  { %1991 = vmatpush.bf16.msra.mxu2 %v2749_v53  ;;  %954 = vst [vmem:[#allocation1 + $0x20] ss:$4 sm:$0xff] %v945_v22  ;;  %v2770_v25 = vld [vmem:[#allocation2 + $0xc8] sm:$0xff]  ;;  %v2761_v2 = vld [vmem:[#allocation2 + $0x80] sm:$0xff]  ;;  %v2784_v27 = vld [vmem:[#allocation2 + $0x138] sm:$0xff] }
 0x2f8   :  { %2004 = vmatpush.bf16.msra.mxu3 %v2757_v54  ;;  %v2769_v26 = vld [vmem:[#allocation2 + $0xc0] sm:$0xff]  ;;  %v2792_v28 = vld [vmem:[#allocation2 + $0x178] sm:$0xff]  ;;  %v2783_v31 = vld [vmem:[#allocation2 + $0x130] sm:$0xff] }
 0x2f9   :  { %v2791_v4 = vld [vmem:[#allocation2 + $0x170] sm:$0xff]  ;;  %v2782_v32 = vld [vmem:[#allocation2 + $0x128] sm:$0xff]  ;;  %v2816_v34 = vld [vmem:[#allocation2 + $0x238] sm:$0xff] }
 0x2fa   :  { %v2790_v33 = vld [vmem:[#allocation2 + $0x168] sm:$0xff]  ;;  %2092 = vmatpush.bf16.msrb.mxu0 %v2816_v34  ;;  %v2824_v35 = vld [vmem:[#allocation2 + $0x278] sm:$0xff]  ;;  %v2781_v36 = vld [vmem:[#allocation2 + $0x120] sm:$0xff] }
 0x2fb   :  { %1992 = vmatpush.bf16.msra.mxu2 %v2748_v55  ;;  %v2789_v37 = vld [vmem:[#allocation2 + $0x160] sm:$0xff]  ;;  %2105 = vmatpush.bf16.msrb.mxu1 %v2824_v35  ;;  %v2815_v15 = vld [vmem:[#allocation2 + $0x230] sm:$0xff]  ;;  %v2780_v39 = vld [vmem:[#allocation2 + $0x118] sm:$0xff] }
 0x2fc   :  { %2005 = vmatpush.bf16.msra.mxu3 %v2756_v56  ;;  %v2823_v38 = vld [vmem:[#allocation2 + $0x270] sm:$0xff]  ;;  %v2788_v40 = vld [vmem:[#allocation2 + $0x158] sm:$0xff]  ;;  %v2814_v41 = vld [vmem:[#allocation2 + $0x228] sm:$0xff] }
 0x2fd   :  { %v2822_v42 = vld [vmem:[#allocation2 + $0x268] sm:$0xff]  ;;  %v2779_v43 = vld [vmem:[#allocation2 + $0x110] sm:$0xff]  ;;  %v2813_v45 = vld [vmem:[#allocation2 + $0x220] sm:$0xff] }
 0x2fe   :  { %2093 = vmatpush.bf16.msrb.mxu0 %v2815_v15  ;;  %v2787_v44 = vld [vmem:[#allocation2 + $0x150] sm:$0xff]  ;;  %v2821_v8 = vld [vmem:[#allocation2 + $0x260] sm:$0xff]  ;;  %v2778_v46 = vld [vmem:[#allocation2 + $0x108] sm:$0xff] }
 0x2ff   :  { %1993 = vmatpush.bf16.msra.mxu2 %v2747_v57  ;;  %2106 = vmatpush.bf16.msrb.mxu1 %v2823_v38  ;;  %v2786_v10 = vld [vmem:[#allocation2 + $0x148] sm:$0xff]  ;;  %v2812_v47 = vld [vmem:[#allocation2 + $0x218] sm:$0xff]  ;;  %v2777_v48 = vld [vmem:[#allocation2 + $0x100] sm:$0xff] }
 0x300   :  { %2006 = vmatpush.bf16.msra.mxu3 %v2755_v17  ;;  %v2785_v49 = vld [vmem:[#allocation2 + $0x140] sm:$0xff]  ;;  %v2820_v50 = vld [vmem:[#allocation2 + $0x258] sm:$0xff]  ;;  %v2811_v55 = vld [vmem:[#allocation2 + $0x210] sm:$0xff] }
 0x301   :  { %v959_v51 = vld.sshfl [vmem:[#allocation1 + $0x20] sm:$0xff pattern:$0x73625140]  ;;  %v960_v52 = vld.sshfl [vmem:[#allocation1 + $0x28] sm:$0xff pattern:$0x73625140] }
 0x302   :  { %2094 = vmatpush.bf16.msrb.mxu0 %v2814_v41  ;;  %v2800_v53 = vld [vmem:[#allocation2 + $0x1b8] sm:$0xff]  ;;  %v993_v56 = vpack.c.bf16 %v959_v51, %v959_v51  ;;  %v994_v57 = vpack.c.bf16 %v960_v52, %v960_v52  ;;  %v3370_v17 = vld.sshfl [vmem:[#allocation1 + $0x30] sm:$0xff pattern:$0x73625140]  ;;  %v2807_v60 = vld [vmem:[#allocation2 + $0x1f0] sm:$0xff] }
 0x303   :  { %1994 = vmatpush.bf16.msra.mxu2 %v2746_v58  ;;  %2107 = vmatpush.bf16.msrb.mxu1 %v2822_v42  ;;  %v2808_v54 = vld [vmem:[#allocation2 + $0x1f8] sm:$0xff]  ;;  %v2819_v58 = vld [vmem:[#allocation2 + $0x250] sm:$0xff]  ;;  %v2810_v0 = vld [vmem:[#allocation2 + $0x208] sm:$0xff] }
 0x304   :  { %2007 = vmatpush.bf16.msra.mxu3 %v2754_v59  ;;  %v947_v59 = vld [vmem:[#allocation5 + $0x18] sm:$0xff]  ;;  %v965_v62 = vld.sshfl [vmem:[#allocation1] sm:$0xff pattern:$0x73625140]  ;;  %v2843_v35 = vld [vmem:[#allocation2 + $0x310] sm:$0xff] }
 0x305   :  { %v997_v11 = vpack.c.bf16 %v965_v62, %v965_v62  ;;  %v2856_v12 = vld [vmem:[#allocation2 + $0x378] sm:$0xff]  ;;  %v2846_v22 = vld [vmem:[#allocation2 + $0x328] sm:$0xff]  ;;  %v2851_v15 = vld [vmem:[#allocation2 + $0x350] sm:$0xff] }
 0x306   :  { %2095 = vmatpush.bf16.msrb.mxu0 %v2813_v45  ;;  %v2840_v34 = vld [vmem:[#allocation2 + $0x2f8] sm:$0xff]  ;;  %v2831_v38 = vld [vmem:[#allocation2 + $0x2b0] sm:$0xff]  ;;  %v2850_v41 = vld [vmem:[#allocation2 + $0x348] sm:$0xff] }
 0x307   :  { %1995 = vmatpush.bf16.msra.mxu2 %v2745_v61  ;;  %2108 = vmatpush.bf16.msrb.mxu1 %v2821_v8  ;;  %v3372_v61 = vld.sshfl [vmem:[#allocation1 + $0x38] sm:$0xff pattern:$0x73625140]  ;;  %v2830_v42 = vld [vmem:[#allocation2 + $0x2a8] sm:$0xff]  ;;  %v2849_v45 = vld [vmem:[#allocation2 + $0x340] sm:$0xff] }
 0x308   :  { %2008 = vmatpush.bf16.msra.mxu3 %v2753_v63  ;;  %v2799_v63 = vld [vmem:[#allocation2 + $0x1b0] sm:$0xff]  ;;  %964 = vst [vmem:[#allocation1 + $0x20] ss:$4 sm:$0xff] %v947_v59  ;;  %v2836_v51 = vld [vmem:[#allocation2 + $0x2d8] sm:$0xff] }
 0x309   :  { %v2827_v52 = vld [vmem:[#allocation2 + $0x290] sm:$0xff]  ;;  %v2864_v59 = vld [vmem:[#allocation2 + $0x3b8] sm:$0xff] }
 0x30a   :  { %1996 = vmatmul.bf16.vlgmr.msra.gmra.mxu2 %v989_v3  ;;  %2096 = vmatpush.bf16.msrb.mxu0 %v2812_v47  ;;  %v2806_v3 = vld [vmem:[#allocation2 + $0x1e8] sm:$0xff]  ;;  %v2873_v62 = vld [vmem:[%s3394_s6] ss:$0 sm:$0xff] }
 0x30b   :  { %2014 = vmatpush.bf16.msrb.mxu2 %v2768_v1  ;;  %2009 = vmatmul.bf16.vlgmr.msra.gmra.mxu3 %v990_v5  ;;  %v2818_v1 = vld [vmem:[#allocation2 + $0x248] sm:$0xff]  ;;  %v2809_v5 = vld [vmem:[#allocation2 + $0x200] sm:$0xff] }
 0x30c   :  { %2027 = vmatpush.bf16.msrb.mxu3 %v2776_v23  ;;  %2109 = vmatpush.bf16.msrb.mxu1 %v2820_v50  ;;  %v2798_v23 = vld [vmem:[#allocation2 + $0x1a8] sm:$0xff]  ;;  %v2828_v50 = vld [vmem:[#allocation2 + $0x298] sm:$0xff] }
 0x30e   :  { %2097 = vmatpush.bf16.msrb.mxu0 %v2811_v55  ;;  %v2834_v55 = vld [vmem:[#allocation2 + $0x2c8] sm:$0xff] }
 0x30f   :  { %2015 = vmatpush.bf16.msrb.mxu2 %v2767_v7  ;;  %v2848_v7 = vld [vmem:[#allocation2 + $0x338] sm:$0xff]  ;;  %v970_v47 = vld.sshfl [vmem:[#allocation1 + $0x28] sm:$0xff pattern:$0x73625140] }
 0x310   :  { %2028 = vmatpush.bf16.msrb.mxu3 %v2775_v9  ;;  %2110 = vmatpush.bf16.msrb.mxu1 %v2819_v58  ;;  %v2817_v9 = vld [vmem:[#allocation2 + $0x240] sm:$0xff]  ;;  %v969_v8 = vld.sshfl [vmem:[#allocation1 + $0x20] sm:$0xff pattern:$0x73625140] }
 0x311   :  { %v968_v58 = vld.sshfl [vmem:[#allocation1 + $0x18] sm:$0xff pattern:$0x73625140] }
 0x312   :  { %2098 = vmatpush.bf16.msrb.mxu0 %v2810_v0  ;;  %v2863_v0 = vld [vmem:[#allocation2 + $0x3b0] sm:$0xff] }
 0x313   :  { %2016 = vmatpush.bf16.msrb.mxu2 %v2766_v13  ;;  %v2797_v13 = vld [vmem:[#allocation2 + $0x1a0] sm:$0xff] }
 0x314   :  { %2029 = vmatpush.bf16.msrb.mxu3 %v2774_v14  ;;  %2111 = vmatpush.bf16.msrb.mxu1 %v2818_v1  ;;  %v2805_v14 = vld [vmem:[#allocation2 + $0x1e0] sm:$0xff] }
 0x315   :  { %v2865_v1 = vld [vmem:[#allocation2 + $0x3c0] sm:$0xff] }
 0x316   :  { %2099 = vmatpush.bf16.msrb.mxu0 %v2809_v5  ;;  %v972_v5 = vld.sshfl [vmem:[#allocation1 + $0x38] sm:$0xff pattern:$0x73625140] }
 0x317   :  { %2017 = vmatpush.bf16.msrb.mxu2 %v2765_v16  ;;  %v966_v16 = vld.sshfl [vmem:[#allocation1 + $0x8] sm:$0xff pattern:$0x73625140] }
 0x318   :  { %2030 = vmatpush.bf16.msrb.mxu3 %v2773_v18  ;;  %2112 = vmatpush.bf16.msrb.mxu1 %v2817_v9  ;;  %v998_v18 = vpack.c.bf16 %v966_v16, %v966_v16  ;;  %v1004_v9 = vpack.c.bf16 %v972_v5, %v972_v5  ;;  %v2858_v16 = vld [vmem:[#allocation2 + $0x388] sm:$0xff] }
 0x319   :  { %2100 = vmatmul.bf16.vlgmr.msrb.gmra.mxu0 %v997_v11  ;;  %v2859_v11 = vld [vmem:[#allocation2 + $0x390] sm:$0xff] }
 0x31a   :  { %2144 = vmatpush.bf16.msra.mxu0 %v2848_v7  ;;  %v2860_v7 = vld [vmem:[#allocation2 + $0x398] sm:$0xff] }
 0x31b   :  { %2018 = vmatpush.bf16.msrb.mxu2 %v2764_v6  ;;  %v2847_v6 = vld [vmem:[#allocation2 + $0x330] sm:$0xff]  ;;  %2113 = vmatmul.bf16.vlgmr.msrb.gmra.mxu1 %v998_v18 }
 0x31c   :  { %2031 = vmatpush.bf16.msrb.mxu3 %v2772_v19  ;;  %2157 = vmatpush.bf16.msra.mxu1 %v2856_v12  ;;  %v2855_v19 = vld [vmem:[#allocation2 + $0x370] sm:$0xff] }
 0x31e   :  { %2145 = vmatpush.bf16.msra.mxu0 %v2847_v6  ;;  %v2857_v6 = vld [vmem:[#allocation2 + $0x380] sm:$0xff] }
 0x31f   :  { %2019 = vmatpush.bf16.msrb.mxu2 %v2763_v20  ;;  %v2796_v20 = vld [vmem:[#allocation2 + $0x198] sm:$0xff] }
 0x320   :  { %2032 = vmatpush.bf16.msrb.mxu3 %v2771_v21  ;;  %v2804_v21 = vld [vmem:[#allocation2 + $0x1d8] sm:$0xff]  ;;  %2158 = vmatpush.bf16.msra.mxu1 %v2855_v19  ;;  %v971_v19 = vld.sshfl [vmem:[#allocation1 + $0x30] sm:$0xff pattern:$0x73625140] }
 0x322   :  { %2146 = vmatpush.bf16.msra.mxu0 %v2846_v22  ;;  %v1003_v22 = vpack.c.bf16 %v971_v19, %v971_v19 }
 0x323   :  { %2020 = vmatpush.bf16.msrb.mxu2 %v2762_v24  ;;  %v2854_v24 = vld [vmem:[#allocation2 + $0x368] sm:$0xff] }
 0x324   :  { %2033 = vmatpush.bf16.msrb.mxu3 %v2770_v25  ;;  %v2795_v25 = vld [vmem:[#allocation2 + $0x190] sm:$0xff]  ;;  %2159 = vmatpush.bf16.msra.mxu1 %v2854_v24 }
 0x327   :  { %2021 = vmatpush.bf16.msrb.mxu2 %v2761_v2  ;;  %v2803_v2 = vld [vmem:[#allocation2 + $0x1d0] sm:$0xff] }
 0x328   :  { %2034 = vmatpush.bf16.msrb.mxu3 %v2769_v26  ;;  %v2845_v26 = vld [vmem:[#allocation2 + $0x320] sm:$0xff] }
 0x329   :  { %2147 = vmatpush.bf16.msra.mxu0 %v2845_v26 }
 0x32a   :  { %2022 = vmatmul.bf16.vlgmr.msrb.gmra.mxu2 %v991_v29  ;;  %v2802_v29 = vld [vmem:[#allocation2 + $0x1c8] sm:$0xff] }
 0x32b   :  { %2040 = vmatpush.bf16.msra.mxu2 %v2784_v27  ;;  %2035 = vmatmul.bf16.vlgmr.msrb.gmra.mxu3 %v992_v30  ;;  %v2853_v27 = vld [vmem:[#allocation2 + $0x360] sm:$0xff]  ;;  %v2844_v30 = vld [vmem:[#allocation2 + $0x318] sm:$0xff] }
 0x32c   :  { %2053 = vmatpush.bf16.msra.mxu3 %v2792_v28  ;;  %v2794_v28 = vld [vmem:[#allocation2 + $0x188] sm:$0xff]  ;;  %2160 = vmatpush.bf16.msra.mxu1 %v2853_v27 }
 0x32d   :  { %2148 = vmatpush.bf16.msra.mxu0 %v2844_v30 }
 0x32f   :  { %2041 = vmatpush.bf16.msra.mxu2 %v2783_v31  ;;  %v2852_v31 = vld [vmem:[#allocation2 + $0x358] sm:$0xff] }
 0x330   :  { %2054 = vmatpush.bf16.msra.mxu3 %v2791_v4  ;;  %v2793_v4 = vld [vmem:[#allocation2 + $0x180] sm:$0xff]  ;;  %2161 = vmatpush.bf16.msra.mxu1 %v2852_v31 }
 0x331   :  { %2149 = vmatpush.bf16.msra.mxu0 %v2843_v35 }
 0x333   :  { %2042 = vmatpush.bf16.msra.mxu2 %v2782_v32  ;;  %v2801_v32 = vld [vmem:[#allocation2 + $0x1c0] sm:$0xff] }
 0x334   :  { %2055 = vmatpush.bf16.msra.mxu3 %v2790_v33  ;;  %v2832_v33 = vld [vmem:[#allocation2 + $0x2b8] sm:$0xff]  ;;  %2162 = vmatpush.bf16.msra.mxu1 %v2851_v15 }
 0x337   :  { %2043 = vmatpush.bf16.msra.mxu2 %v2781_v36  ;;  %v995_v36 = vpack.c.bf16 %v3370_v17, %v3370_v17  ;;  %v967_v17 = vld.sshfl [vmem:[#allocation1 + $0x10] sm:$0xff pattern:$0x73625140] }
 0x338   :  { %2056 = vmatpush.bf16.msra.mxu3 %v2789_v37  ;;  %v996_v37 = vpack.c.bf16 %v3372_v61, %v3372_v61  ;;  %2163 = vmatpush.bf16.msra.mxu1 %v2850_v41  ;;  %v2866_v61 = vld [vmem:[#allocation2 + $0x3c8] sm:$0xff] }
 0x33b   :  { %2044 = vmatpush.bf16.msra.mxu2 %v2780_v39  ;;  %v2839_v39 = vld [vmem:[#allocation2 + $0x2f0] sm:$0xff] }
 0x33c   :  { %2057 = vmatpush.bf16.msra.mxu3 %v2788_v40  ;;  %v2842_v40 = vld [vmem:[#allocation2 + $0x308] sm:$0xff]  ;;  %2164 = vmatpush.bf16.msra.mxu1 %v2849_v45 }
 0x33d   :  { %2150 = vmatpush.bf16.msra.mxu0 %v2842_v40 }
 0x33f   :  { %2045 = vmatpush.bf16.msra.mxu2 %v2779_v43  ;;  %v2838_v43 = vld [vmem:[#allocation2 + $0x2e8] sm:$0xff] }
 0x340   :  { %2058 = vmatpush.bf16.msra.mxu3 %v2787_v44  ;;  %v2841_v44 = vld [vmem:[#allocation2 + $0x300] sm:$0xff] }
 0x341   :  { %2151 = vmatpush.bf16.msra.mxu0 %v2841_v44 }
 0x343   :  { %2046 = vmatpush.bf16.msra.mxu2 %v2778_v46  ;;  %v2829_v46 = vld [vmem:[#allocation2 + $0x2a0] sm:$0xff] }
 0x344   :  { %2059 = vmatpush.bf16.msra.mxu3 %v2786_v10  ;;  %v2837_v10 = vld [vmem:[#allocation2 + $0x2e0] sm:$0xff] }
 0x347   :  { %2047 = vmatpush.bf16.msra.mxu2 %v2777_v48  ;;  %v1001_v48 = vpack.c.bf16 %v969_v8, %v969_v8 }
 0x348   :  { %2060 = vmatpush.bf16.msra.mxu3 %v2785_v49  ;;  %v1002_v49 = vpack.c.bf16 %v970_v47, %v970_v47 }
 0x349   :  { %2152 = vmatmul.bf16.vlgmr.msra.gmra.mxu0 %v1001_v48 }
 0x34a   :  { %2048 = vmatmul.bf16.vlgmr.msra.gmra.mxu2 %v993_v56  ;;  %2165 = vmatmul.bf16.vlgmr.msra.gmra.mxu1 %v1002_v49  ;;  %v2825_v56 = vld [vmem:[#allocation2 + $0x280] sm:$0xff] }
 0x34b   :  { %2066 = vmatpush.bf16.msrb.mxu2 %v2800_v53  ;;  %2061 = vmatmul.bf16.vlgmr.msra.gmra.mxu3 %v994_v57  ;;  %v2835_v53 = vld [vmem:[#allocation2 + $0x2d0] sm:$0xff]  ;;  %v2833_v57 = vld [vmem:[#allocation2 + $0x2c0] sm:$0xff] }
 0x34c   :  { %2079 = vmatpush.bf16.msrb.mxu3 %v2808_v54  ;;  %v2826_v54 = vld [vmem:[#allocation2 + $0x288] sm:$0xff] }
 0x34f   :  { %2067 = vmatpush.bf16.msrb.mxu2 %v2799_v63  ;;  %v999_v63 = vpack.c.bf16 %v967_v17, %v967_v17 }
 0x350   :  { %2080 = vmatpush.bf16.msrb.mxu3 %v2807_v60  ;;  %v1000_v60 = vpack.c.bf16 %v968_v58, %v968_v58 }
 0x353   :  { %2068 = vmatpush.bf16.msrb.mxu2 %v2798_v23  ;;  %v2862_v23 = vld [vmem:[#allocation2 + $0x3a8] sm:$0xff] }
 0x354   :  { %2081 = vmatpush.bf16.msrb.mxu3 %v2806_v3  ;;  %v2861_v3 = vld [vmem:[#allocation2 + $0x3a0] sm:$0xff] }
 0x357   :  { %2069 = vmatpush.bf16.msrb.mxu2 %v2797_v13 }
 0x358   :  { %2082 = vmatpush.bf16.msrb.mxu3 %v2805_v14 }
 0x35b   :  { %2070 = vmatpush.bf16.msrb.mxu2 %v2796_v20 }
 0x35c   :  { %2083 = vmatpush.bf16.msrb.mxu3 %v2804_v21 }
 0x35f   :  { %2071 = vmatpush.bf16.msrb.mxu2 %v2795_v25 }
 0x360   :  { %2084 = vmatpush.bf16.msrb.mxu3 %v2803_v2 }
 0x363   :  { %2072 = vmatpush.bf16.msrb.mxu2 %v2794_v28 }
 0x364   :  { %2085 = vmatpush.bf16.msrb.mxu3 %v2802_v29 }
 0x367   :  { %2073 = vmatpush.bf16.msrb.mxu2 %v2793_v4 }
 0x368   :  { %2086 = vmatpush.bf16.msrb.mxu3 %v2801_v32 }
 0x36a   :  { %2074 = vmatmul.bf16.vlgmr.msrb.gmra.mxu2 %v995_v36 }
 0x36b   :  { %2118 = vmatpush.bf16.msra.mxu2 %v2832_v33  ;;  %2087 = vmatmul.bf16.vlgmr.msrb.gmra.mxu3 %v996_v37 }
 0x36c   :  { %2131 = vmatpush.bf16.msra.mxu3 %v2840_v34 }
 0x36f   :  { %2119 = vmatpush.bf16.msra.mxu2 %v2831_v38 }
 0x370   :  { %2132 = vmatpush.bf16.msra.mxu3 %v2839_v39 }
 0x373   :  { %2120 = vmatpush.bf16.msra.mxu2 %v2830_v42 }
 0x374   :  { %2133 = vmatpush.bf16.msra.mxu3 %v2838_v43 }
 0x377   :  { %2121 = vmatpush.bf16.msra.mxu2 %v2829_v46 }
 0x378   :  { %2134 = vmatpush.bf16.msra.mxu3 %v2837_v10 }
 0x37b   :  { %2122 = vmatpush.bf16.msra.mxu2 %v2828_v50 }
 0x37c   :  { %2135 = vmatpush.bf16.msra.mxu3 %v2836_v51 }
 0x37f   :  { %2123 = vmatpush.bf16.msra.mxu2 %v2827_v52 }
 0x380   :  { %2136 = vmatpush.bf16.msra.mxu3 %v2835_v53 }
 0x383   :  { %2124 = vmatpush.bf16.msra.mxu2 %v2826_v54 }
 0x384   :  { %2137 = vmatpush.bf16.msra.mxu3 %v2834_v55 }
 0x387   :  { %2125 = vmatpush.bf16.msra.mxu2 %v2825_v56 }
 0x388   :  { %2138 = vmatpush.bf16.msra.mxu3 %v2833_v57 }
 0x38a   :  { %2126 = vmatmul.bf16.vlgmr.msra.gmra.mxu2 %v999_v63 }
 0x38b   :  { %2170 = vmatpush.bf16.msrb.mxu2 %v2864_v59  ;;  %2139 = vmatmul.bf16.vlgmr.msra.gmra.mxu3 %v1000_v60  ;;  %v2874_v59 = vld [vmem:[%s3395_s7] ss:$0 sm:$0xff] }
 0x38c   :  { %2189 = vmatpush.bf16.msrb.mxu3 %v2866_v61 }
 0x38d   :  { %v1997_v12 = vpop.f32.mrf.mxu2 }
 0x38e   :  { %v2010_v13 = vpop.f32.mrf.mxu3  ;;  %v1998_v14 = vadd.f32 %v2873_v62, %v1997_v12 }
 0x38f   :  { %2171 = vmatpush.bf16.msrb.mxu2 %v2863_v0 }
 0x390   :  { %2190 = vmatpush.bf16.msrb.mxu3 %v2865_v1  ;;  %v2011_v18 = vadd.f32 %v2010_v13, %v1998_v14  ;;  %v2875_v1 = vld [vmem:[#allocation6] ss:$0 sm:$0xff] }
 0x393   :  { %2172 = vmatpush.bf16.msrb.mxu2 %v2862_v23 }
 0x395   :  { %v1999_v20 = vpop.f32.mrf.mxu2 }
 0x396   :  { %v2012_v21 = vpop.f32.mrf.mxu3  ;;  %v2101_v4 = vpop.f32.mrf.mxu0 }
 0x397   :  { %2173 = vmatpush.bf16.msrb.mxu2 %v2861_v3 }
 0x398   :  { %v2114_v33 = vpop.f32.mrf.mxu1 }
 0x39b   :  { %2174 = vmatpush.bf16.msrb.mxu2 %v2860_v7  ;;  %2743 = vmatmul.msk.bf16.vlgmr.msrb.gmra.mxu3 %vm617_vm6, %v1004_v9 }
 0x39e   :  { %v2103_v36 = vpop.f32.mrf.mxu0 }
 0x39f   :  { %2175 = vmatpush.bf16.msrb.mxu2 %v2859_v11 }
 0x3a0   :  { %v2116_v37 = vpop.f32.mrf.mxu1 }
 0x3a3   :  { %2176 = vmatpush.bf16.msrb.mxu2 %v2858_v16 }
 0x3a7   :  { %2177 = vmatpush.bf16.msrb.mxu2 %v2857_v6 }
 0x3aa   :  { %2178 = vmatmul.bf16.vlgmr.msrb.gmra.mxu2 %v1003_v22 }
 0x3ad   :  { %v2023_v24 = vpop.f32.mrf.mxu2 }
 0x3ae   :  { %v2036_v25 = vpop.f32.mrf.mxu3  ;;  %v2024_v2 = vadd.f32 %v2023_v24, %v2011_v18 }
 0x3b0   :  { %v2037_v26 = vadd.f32 %v2036_v25, %v2024_v2 }
 0x3b5   :  { %v2025_v27 = vpop.f32.mrf.mxu2 }
 0x3b6   :  { %v2038_v28 = vpop.f32.mrf.mxu3 }
 0x3c6   :  { %v2153_v42 = vpop.f32.mrf.mxu0 }
 0x3c7   :  { %v2166_v43 = vpop.f32.mrf.mxu1 }
 0x3cd   :  { %v2049_v29 = vpop.f32.mrf.mxu2 }
 0x3ce   :  { %v2062_v30 = vpop.f32.mrf.mxu3  ;;  %v2050_v31 = vadd.f32 %v2049_v29, %v2037_v26  ;;  %v2155_v46 = vpop.f32.mrf.mxu0 }
 0x3cf   :  { %v2168_v10 = vpop.f32.mrf.mxu1 }
 0x3d0   :  { %v2063_v32 = vadd.f32 %v2062_v30, %v2050_v31 }
 0x3d5   :  { %v2051_v34 = vpop.f32.mrf.mxu2 }
 0x3d6   :  { %v2064_v35 = vpop.f32.mrf.mxu3 }
 0x3ed   :  { %v2075_v15 = vpop.f32.mrf.mxu2 }
 0x3ee   :  { %v2088_v38 = vpop.f32.mrf.mxu3  ;;  %v2076_v39 = vadd.f32 %v2075_v15, %v2063_v32 }
 0x3f0   :  { %v2089_v40 = vadd.f32 %v2088_v38, %v2076_v39 }
 0x3f2   :  { %v2102_v41 = vadd.f32 %v2101_v4, %v2089_v40 }
 0x3f4   :  { %v2115_v44 = vadd.f32 %v2114_v33, %v2102_v41 }
 0x3f5   :  { %v2077_v45 = vpop.f32.mrf.mxu2 }
 0x3f6   :  { %v2090_v8 = vpop.f32.mrf.mxu3 }
 0x40d   :  { %v2127_v47 = vpop.f32.mrf.mxu2 }
 0x40e   :  { %v2140_v48 = vpop.f32.mrf.mxu3  ;;  %v2128_v51 = vadd.f32 %v2127_v47, %v2115_v44 }
 0x410   :  { %v2141_v53 = vadd.f32 %v2140_v48, %v2128_v51 }
 0x412   :  { %v2154_v54 = vadd.f32 %v2153_v42, %v2141_v53 }
 0x414   :  { %v2167_v56 = vadd.f32 %v2166_v43, %v2154_v54 }
 0x415   :  { %v2129_v49 = vpop.f32.mrf.mxu2 }
 0x416   :  { %v2142_v50 = vpop.f32.mrf.mxu3 }
 0x41e   :  { %v2192_v52 = vpop.f32.mrf.mxu3 }
 0x426   :  { %v2194_v55 = vpop.f32.mrf.mxu3 }
 0x42d   :  { %v2179_v57 = vpop.f32.mrf.mxu2 }
 0x42e   :  { %v2180_v17 = vadd.f32 %v2179_v57, %v2167_v56 }
 0x430   :  { %v2193_v58 = vadd.f32 %v2192_v52, %v2180_v17 }
 0x432   :  { %v2196_v61 = vmax.f32 %v2193_v58, 0.0 }
 0x434   :  { %v2201_v63 = vmul.f32 %v2874_v59, %v2196_v61 }
 0x435   :  { %v2181_v60 = vpop.f32.mrf.mxu2 }
 0x436   :  { %v2203_v0 = vsel %vm2202_vm11, %v2201_v63, 0.0 }
 0x437   :  { %2204 = vadd.xlane.f32.xlu0 %v2203_v0 }
 0x4aa   :  { %v2205_v23 = vpop.xlane.xlu0 %2204 }
 0x4ab   :  { %v2210_v3 = vadd.f32 %v2875_v1, %v2205_v23 }
 0x4ad   :  { %2212 = vst.msk [vmem:[%s3396_s9] sm:$0x3] %vm2211_vm12, %v2210_v3 }
 0x4ae   :  { %2217 = vsyncmov [#allocation3] }
 0x4b1   :  { %s2218_s27 = vpop.sfrf %2217 }
 0x4b2   :  { %p2744_p0 = scmp.ne.s32.totalorder %s2218_s27, 0 }
 0x4b4   :  { %2222 = shalt.err (%p2744_p0)  }

</bundles_post_ra>
